<compile_context>
chip_gen: v7x
topology: tpu7x:2x2x1
jax: 0.10.0
libtpu: 0.0.40
codegen_flags: <defaults>
</compile_context>

<pallas_src>
import functools

import jax
import jax.numpy as jnp
from jax.experimental import pallas as pl
from jax.experimental.pallas import tpu as pltpu


def bc_loss_kernel(x_ref, w1_ref, b1_ref, w2_ref, b2_ref, w3_ref, b3_ref,
                   loss_ref, acc_ref, *, state_dim, action_dim, inv_n_total):
    """One grid step over a [TM, state_dim+action_dim] batch tile.

    Grid is (num_partials, steps_per_partial): axis 0 is "parallel" (per-core
    partial sums), axis 1 is the sequential reduction over batch tiles.

    x_ref    : [TM, F]  streamed input tile (F = state_dim + action_dim)
    w*_ref   : resident weights, stored [in, out]
    b*_ref   : resident biases, [1, out]
    loss_ref : [1, 1]   this partial's output (written on the last step only)
    acc_ref  : [TM, 1]  f32 VMEM running per-row sum of squared errors
    """
    step = pl.program_id(1)

    @pl.when(step == 0)
    def _():
        acc_ref[...] = jnp.zeros_like(acc_ref)

    x = x_ref[...]                                   # single tile load
    feat = x.shape[-1]
    state = x[:, :state_dim]                         # static lane slice
    target = x[:, feat - action_dim:]                # == x[:, -action_dim:]

    h1 = jnp.tanh(
        jnp.dot(state, w1_ref[...], preferred_element_type=jnp.float32)
        + b1_ref[...])
    h2 = jnp.tanh(
        jnp.dot(h1, w2_ref[...], preferred_element_type=jnp.float32)
        + b2_ref[...])
    pred = (jnp.dot(h2, w3_ref[...], preferred_element_type=jnp.float32)
            + b3_ref[...])

    diff = pred - target
    # Lane-reduce per row only; keep the accumulator vector-shaped so the
    # per-step work is a pure VPU add (no sublane reduce, no scalar RMW chain).
    acc_ref[...] += jnp.sum(diff * diff, axis=-1, keepdims=True)

    @pl.when(step == pl.num_programs(1) - 1)
    def _():
        # One sublane (XLU) reduce + one scale at the very end of this partial.
        loss_ref[...] = (jnp.sum(acc_ref[...], axis=0, keepdims=True)
                         * jnp.float32(inv_n_total))


def _pick_tiling(batch, max_tile=4096):
    """Returns (batch_tile, steps_per_partial, num_partials)."""
    if batch <= max_tile:
        # Single full-batch tile: one grid point, no streaming at all.
        return batch, 1, 1
    # Largest multiple-of-8 tile <= max_tile that divides the batch.
    tile = None
    for t in range(max_tile, 7, -8):
        if batch % t == 0:
            tile = t
            break
    if tile is None:
        # No clean divisor: fall back to one full-batch tile (always legal).
        return batch, 1, 1
    n_tiles = batch // tile
    # Split the streamed reduction into 2 independent partials when possible:
    # uses both TensorCores on v7x, free on 1-TC generations.
    num_partials = 2 if n_tiles % 2 == 0 else 1
    return tile, n_tiles // num_partials, num_partials


def bc_forward(x, params, state_dim, action_dim, *, max_tile=4096):
    """Reproduces BC.forward(x): split x into state / target, run the MLP
    encoder, and return the scalar MSE loss. The whole hot path runs in one
    Pallas kernel; for small/medium batches it is a single grid step."""
    w1, b1, w2, b2, w3, b3 = params
    batch, feat = x.shape
    hidden = w1.shape[1]

    batch_tile, steps_per_partial, num_partials = _pick_tiling(batch, max_tile)
    assert batch_tile * steps_per_partial * num_partials == batch
    grid = (num_partials, steps_per_partial)

    n_total = batch * action_dim
    kernel = functools.partial(
        bc_loss_kernel,
        state_dim=state_dim, action_dim=action_dim,
        inv_n_total=1.0 / n_total)

    def resident(shape):
        # Weights / biases: same (only) block every grid step -> stay in VMEM.
        return pl.BlockSpec(shape, lambda p, s: (0,) * len(shape))

    spp = steps_per_partial  # closure constant for the x index_map

    flops = 2 * batch * hidden * (state_dim + hidden + action_dim) \
        + 3 * batch * action_dim
    bytes_accessed = 4 * (x.size + w1.size + w2.size + w3.size
                          + b1.size + b2.size + b3.size + num_partials)

    partials = pl.pallas_call(
        kernel,
        out_shape=jax.ShapeDtypeStruct((num_partials, 1), jnp.float32),
        grid=grid,
        in_specs=[
            pl.BlockSpec((batch_tile, feat),
                         lambda p, s: (p * spp + s, 0)),      # streamed x
            resident(w1.shape), resident((1, hidden)),
            resident(w2.shape), resident((1, hidden)),
            resident(w3.shape), resident((1, action_dim)),
        ],
        out_specs=pl.BlockSpec((1, 1), lambda p, s: (p, 0)),
        scratch_shapes=[pltpu.VMEM((batch_tile, 1), jnp.float32)],
        compiler_params=pltpu.CompilerParams(
            # Axis 0: independent partial sums -> "parallel" (megacore on v7x).
            # Axis 1: sequential reduction over batch tiles -> "arbitrary".
            dimension_semantics=("parallel", "arbitrary")),
        cost_estimate=pl.CostEstimate(
            flops=flops,
            transcendentals=2 * batch * hidden,   # two tanh layers
            bytes_accessed=bytes_accessed),
    )(x, w1, b1.reshape(1, -1), w2, b2.reshape(1, -1), w3, b3.reshape(1, -1))

    if num_partials == 1:
        return partials[0, 0]
    return jnp.sum(partials)


def init_params(key, state_dim, action_dim, hidden_dim):
    """Deterministic init mimicking nn.Linear's U(-1/sqrt(fan_in), 1/sqrt(fan_in)).
    Weights are stored as [in, out] (transposed vs. PyTorch's [out, in])."""
    ks = jax.random.split(key, 6)

    def lin(kw, kb, fan_in, fan_out):
        bound = 1.0 / jnp.sqrt(jnp.float32(fan_in))
        w = jax.random.uniform(kw, (fan_in, fan_out), jnp.float32, -bound, bound)
        b = jax.random.uniform(kb, (fan_out,), jnp.float32, -bound, bound)
        return w, b

    w1, b1 = lin(ks[0], ks[1], state_dim, hidden_dim)
    w2, b2 = lin(ks[2], ks[3], hidden_dim, hidden_dim)
    w3, b3 = lin(ks[4], ks[5], hidden_dim, action_dim)
    return (w1, b1, w2, b2, w3, b3)


if __name__ == "__main__":
    state_dim, action_dim, hidden_dim = 16, 4, 32
    batch = 256   # <= max_tile -> one full-batch tile, single grid step

    key = jax.random.PRNGKey(0)
    k_params, k_x = jax.random.split(key)

    params = init_params(k_params, state_dim, action_dim, hidden_dim)
    # x packs [state | action_target] along the feature axis, exactly as the
    # PyTorch module expects: x[:, :state_dim] and x[:, -action_dim:].
    x = jax.random.normal(k_x, (batch, state_dim + action_dim), jnp.float32)

    loss = bc_forward(x, params, state_dim, action_dim)
    jax.block_until_ready(loss)

    # Pure-JAX reference check for correctness.
    w1, b1, w2, b2, w3, b3 = params
    state = x[:, :state_dim]
    target = x[:, -action_dim:]
    h1 = jnp.tanh(state @ w1 + b1)
    h2 = jnp.tanh(h1 @ w2 + b2)
    pred = h2 @ w3 + b3
    ref_loss = jnp.mean((pred - target) ** 2)
    assert jnp.allclose(loss, ref_loss, rtol=1e-4, atol=1e-5), (loss, ref_loss)

    # Also exercise the streamed multi-tile / multi-partial path (tiny max_tile
    # forces 4 tiles split into 2 parallel partials) to validate the reduction.
    loss_stream = bc_forward(x, params, state_dim, action_dim, max_tile=64)
    jax.block_until_ready(loss_stream)
    assert jnp.allclose(loss_stream, ref_loss, rtol=1e-4, atol=1e-5), (
        loss_stream, ref_loss)

    print("KERNEL_OK")
</pallas_src>

<mosaic_0001>
module attributes {stable_mosaic.version = 11 : i64} {
  func.func @bc_loss_kernel(%arg0: i32, %arg1: i32, %arg2: memref<256x20xf32, #tpu.memory_space<vmem>>, %arg3: memref<16x32xf32, #tpu.memory_space<vmem>>, %arg4: memref<1x32xf32, #tpu.memory_space<vmem>>, %arg5: memref<32x32xf32, #tpu.memory_space<vmem>>, %arg6: memref<1x32xf32, #tpu.memory_space<vmem>>, %arg7: memref<32x4xf32, #tpu.memory_space<vmem>>, %arg8: memref<1x4xf32, #tpu.memory_space<vmem>>, %arg9: memref<1x1xf32, #tpu.memory_space<vmem>>, %arg10: memref<256x1xf32, #tpu.memory_space<vmem>>) attributes {dimension_semantics = [#tpu.dimension_semantics<parallel>, #tpu.dimension_semantics<arbitrary>], iteration_bounds = array<i64: 1, 1>, scalar_prefetch = 0 : i64, scratch_operands = 1 : i64, tpu.core_type = #tpu.core_type<tc>, window_params = [{transform_indices = @transform_0, window_bounds = array<i64: 256, 20>}, {pipeline_mode = #tpu.pipeline_mode<synchronous>, transform_indices = @transform_1, window_bounds = array<i64: 16, 32>}, {pipeline_mode = #tpu.pipeline_mode<synchronous>, transform_indices = @transform_2, window_bounds = array<i64: 1, 32>}, {pipeline_mode = #tpu.pipeline_mode<synchronous>, transform_indices = @transform_3, window_bounds = array<i64: 32, 32>}, {pipeline_mode = #tpu.pipeline_mode<synchronous>, transform_indices = @transform_4, window_bounds = array<i64: 1, 32>}, {pipeline_mode = #tpu.pipeline_mode<synchronous>, transform_indices = @transform_5, window_bounds = array<i64: 32, 4>}, {pipeline_mode = #tpu.pipeline_mode<synchronous>, transform_indices = @transform_6, window_bounds = array<i64: 1, 4>}, {transform_indices = @transform_7, window_bounds = array<i64: 1, 1>}]} {
    %c0_i32 = arith.constant 0 : i32
    %0 = arith.cmpi eq, %arg1, %c0_i32 : i32
    %1 = arith.extui %0 : i1 to i32
    %c0_i32_0 = arith.constant 0 : i32
    %2 = arith.cmpi ne, %1, %c0_i32_0 : i32
    scf.if %2 {
      %cst_23 = arith.constant 0.000000e+00 : f32
      %33 = vector.broadcast %cst_23 : f32 to vector<256x1xf32>
      %c0_24 = arith.constant 0 : index
      %c0_25 = arith.constant 0 : index
      %34 = vector.load %arg10[%c0_24, %c0_25] : memref<256x1xf32, #tpu.memory_space<vmem>>, vector<256x1xf32>
      tpu.vector_store %arg10[%c0_24, %c0_25], %33 {strides = array<i32>} : memref<256x1xf32, #tpu.memory_space<vmem>>, vector<256x1xf32>,
    } else {
    }
    %c0 = arith.constant 0 : index
    %c0_1 = arith.constant 0 : index
    %3 = vector.load %arg2[%c0, %c0_1] : memref<256x20xf32, #tpu.memory_space<vmem>>, vector<256x20xf32>
    %4 = vector.extract_strided_slice %3 {offsets = [0, 0], sizes = [256, 16], strides = [1, 1]} : vector<256x20xf32> to vector<256x16xf32>
    %5 = vector.extract_strided_slice %3 {offsets = [0, 16], sizes = [256, 4], strides = [1, 1]} : vector<256x20xf32> to vector<256x4xf32>
    %c0_2 = arith.constant 0 : index
    %c0_3 = arith.constant 0 : index
    %6 = vector.load %arg3[%c0_2, %c0_3] : memref<16x32xf32, #tpu.memory_space<vmem>>, vector<16x32xf32>
    %cst = arith.constant dense<0.000000e+00> : vector<256x32xf32>
    %7 = tpu.matmul %4, %6, %cst {dimension_numbers = #tpu.dot_dimension_numbers<[1], [0], [0], [1], [0, 0, 1, 1], [], []>} : vector<256x16xf32>, vector<16x32xf32>, vector<256x32xf32> -> vector<256x32xf32>
    %c0_4 = arith.constant 0 : index
    %c0_5 = arith.constant 0 : index
    %8 = vector.load %arg4[%c0_4, %c0_5] : memref<1x32xf32, #tpu.memory_space<vmem>>, vector<1x32xf32>
    %9 = vector.broadcast %8 : vector<1x32xf32> to vector<256x32xf32>
    %10 = arith.addf %7, %9 : vector<256x32xf32>
    %11 = math.tanh %10 : vector<256x32xf32>
    %c0_6 = arith.constant 0 : index
    %c0_7 = arith.constant 0 : index
    %12 = vector.load %arg5[%c0_6, %c0_7] : memref<32x32xf32, #tpu.memory_space<vmem>>, vector<32x32xf32>
    %cst_8 = arith.constant dense<0.000000e+00> : vector<256x32xf32>
    %13 = tpu.matmul %11, %12, %cst_8 {dimension_numbers = #tpu.dot_dimension_numbers<[1], [0], [0], [1], [0, 0, 1, 1], [], []>} : vector<256x32xf32>, vector<32x32xf32>, vector<256x32xf32> -> vector<256x32xf32>
    %c0_9 = arith.constant 0 : index
    %c0_10 = arith.constant 0 : index
    %14 = vector.load %arg6[%c0_9, %c0_10] : memref<1x32xf32, #tpu.memory_space<vmem>>, vector<1x32xf32>
    %15 = vector.broadcast %14 : vector<1x32xf32> to vector<256x32xf32>
    %16 = arith.addf %13, %15 : vector<256x32xf32>
    %17 = math.tanh %16 : vector<256x32xf32>
    %c0_11 = arith.constant 0 : index
    %c0_12 = arith.constant 0 : index
    %18 = vector.load %arg7[%c0_11, %c0_12] : memref<32x4xf32, #tpu.memory_space<vmem>>, vector<32x4xf32>
    %cst_13 = arith.constant dense<0.000000e+00> : vector<256x4xf32>
    %19 = tpu.matmul %17, %18, %cst_13 {dimension_numbers = #tpu.dot_dimension_numbers<[1], [0], [0], [1], [0, 0, 1, 1], [], []>} : vector<256x32xf32>, vector<32x4xf32>, vector<256x4xf32> -> vector<256x4xf32>
    %c0_14 = arith.constant 0 : index
    %c0_15 = arith.constant 0 : index
    %20 = vector.load %arg8[%c0_14, %c0_15] : memref<1x4xf32, #tpu.memory_space<vmem>>, vector<1x4xf32>
    %21 = vector.broadcast %20 : vector<1x4xf32> to vector<256x4xf32>
    %22 = arith.addf %19, %21 : vector<256x4xf32>
    %23 = arith.subf %22, %5 : vector<256x4xf32>
    %c0_16 = arith.constant 0 : index
    %c0_17 = arith.constant 0 : index
    %24 = vector.load %arg10[%c0_16, %c0_17] : memref<256x1xf32, #tpu.memory_space<vmem>>, vector<256x1xf32>
    %25 = arith.mulf %23, %23 : vector<256x4xf32>
    %cst_18 = arith.constant dense<0.000000e+00> : vector<256xf32>
    %26 = vector.multi_reduction <add>, %25, %cst_18 [1] : vector<256x4xf32> to vector<256xf32>
    %27 = vector.shape_cast %26 : vector<256xf32> to vector<256x1xf32>
    %28 = arith.addf %24, %27 : vector<256x1xf32>
    %c0_19 = arith.constant 0 : index
    %c0_20 = arith.constant 0 : index
    %29 = vector.load %arg10[%c0_19, %c0_20] : memref<256x1xf32, #tpu.memory_space<vmem>>, vector<256x1xf32>
    tpu.vector_store %arg10[%c0_19, %c0_20], %28 {strides = array<i32>} : memref<256x1xf32, #tpu.memory_space<vmem>>, vector<256x1xf32>,
    %c0_i32_21 = arith.constant 0 : i32
    %30 = arith.cmpi eq, %arg1, %c0_i32_21 : i32
    %31 = arith.extui %30 : i1 to i32
    %c0_i32_22 = arith.constant 0 : i32
    %32 = arith.cmpi ne, %31, %c0_i32_22 : i32
    scf.if %32 {
      %c0_23 = arith.constant 0 : index
      %c0_24 = arith.constant 0 : index
      %33 = vector.load %arg10[%c0_23, %c0_24] : memref<256x1xf32, #tpu.memory_space<vmem>>, vector<256x1xf32>
      %cst_25 = arith.constant dense<0.000000e+00> : vector<1xf32>
      %34 = vector.multi_reduction <add>, %33, %cst_25 [0] : vector<256x1xf32> to vector<1xf32>
      %35 = vector.shape_cast %34 : vector<1xf32> to vector<1x1xf32>
      %cst_26 = arith.constant 9.765625E-4 : f32
      %36 = vector.broadcast %cst_26 : f32 to vector<1x1xf32>
      %37 = arith.mulf %35, %36 : vector<1x1xf32>
      %c0_27 = arith.constant 0 : index
      %c0_28 = arith.constant 0 : index
      %38 = vector.load %arg9[%c0_27, %c0_28] : memref<1x1xf32, #tpu.memory_space<vmem>>, vector<1x1xf32>
      tpu.vector_store %arg9[%c0_27, %c0_28], %37 {strides = array<i32>} : memref<1x1xf32, #tpu.memory_space<vmem>>, vector<1x1xf32>,
    } else {
    }
    return
  }
  func.func @transform_0(%arg0: i32, %arg1: i32) -> (i32, i32) {
    %c1_i32 = arith.constant 1 : i32
    %0 = arith.muli %arg0, %c1_i32 : i32
    %1 = arith.addi %0, %arg1 : i32
    %c0_i32 = arith.constant 0 : i32
    %c0_i32_0 = arith.constant 0 : i32
    return %1, %c0_i32 : i32, i32
  }
  func.func @transform_1(%arg0: i32, %arg1: i32) -> (i32, i32) {
    %c0_i32 = arith.constant 0 : i32
    %c0_i32_0 = arith.constant 0 : i32
    %c0_i32_1 = arith.constant 0 : i32
    return %c0_i32, %c0_i32_0 : i32, i32
  }
  func.func @transform_2(%arg0: i32, %arg1: i32) -> (i32, i32) {
    %c0_i32 = arith.constant 0 : i32
    %c0_i32_0 = arith.constant 0 : i32
    %c0_i32_1 = arith.constant 0 : i32
    return %c0_i32, %c0_i32_0 : i32, i32
  }
  func.func @transform_3(%arg0: i32, %arg1: i32) -> (i32, i32) {
    %c0_i32 = arith.constant 0 : i32
    %c0_i32_0 = arith.constant 0 : i32
    %c0_i32_1 = arith.constant 0 : i32
    return %c0_i32, %c0_i32_0 : i32, i32
  }
  func.func @transform_4(%arg0: i32, %arg1: i32) -> (i32, i32) {
    %c0_i32 = arith.constant 0 : i32
    %c0_i32_0 = arith.constant 0 : i32
    %c0_i32_1 = arith.constant 0 : i32
    return %c0_i32, %c0_i32_0 : i32, i32
  }
  func.func @transform_5(%arg0: i32, %arg1: i32) -> (i32, i32) {
    %c0_i32 = arith.constant 0 : i32
    %c0_i32_0 = arith.constant 0 : i32
    %c0_i32_1 = arith.constant 0 : i32
    return %c0_i32, %c0_i32_0 : i32, i32
  }
  func.func @transform_6(%arg0: i32, %arg1: i32) -> (i32, i32) {
    %c0_i32 = arith.constant 0 : i32
    %c0_i32_0 = arith.constant 0 : i32
    %c0_i32_1 = arith.constant 0 : i32
    return %c0_i32, %c0_i32_0 : i32, i32
  }
  func.func @transform_7(%arg0: i32, %arg1: i32) -> (i32, i32) {
    %c0_i32 = arith.constant 0 : i32
    %c0_i32_0 = arith.constant 0 : i32
    return %arg0, %c0_i32 : i32, i32
  }
}

</mosaic_0001>

<bundles_post_ra>
// kernel: tpu_custom_call.1
= control target key start
LH: loop header
LB: loop body
LE: loop exit
PB: predicated region body
PF: predicated region fallthrough
CT: control target
= control target key end

     0   :  { %vm127_vm0 = vcmask 130048   ;;  %s2953_s0 = inlined_call_operand.vmem [shape: f32[256,20], index: 0, kind: input, shape index: {}]   ;;  %s2954_s1 = inlined_call_operand.vmem [shape: f32[16,32], index: 1, kind: input, shape index: {}]   ;;  %s2955_s2 = inlined_call_operand.vmem [shape: f32[1,32], index: 2, kind: input, shape index: {}]   ;;  %s2956_s3 = inlined_call_operand.vmem [shape: f32[32,32], index: 3, kind: input, shape index: {}]   ;;  %s2957_s4 = inlined_call_operand.vmem [shape: f32[1,32], index: 4, kind: input, shape index: {}]   ;;  %s2958_s5 = inlined_call_operand.vmem [shape: f32[32,4], index: 5, kind: input, shape index: {}]   ;;  %s2959_s6 = inlined_call_operand.vmem [shape: f32[1,4], index: 6, kind: input, shape index: {}]   ;;  %s2960_s7 = inlined_call_operand.hbm [shape: f32[1,1], index: 7, kind: output, shape index: {}]  }
   0x1   :  { %v118_v0 = vld [vmem:[%s2954_s1] sm:$0xff]  ;;  %v119_v1 = vld [vmem:[%s2954_s1 + $0x8] sm:$0xff]  ;;  %v2269_v5 = vld [vmem:[%s2953_s0 + $0x10] sm:$0xff] }
   0x2   :  { %v2257_v2 = vld [vmem:[%s2953_s0] sm:$0xff]  ;;  %v2028_v3 = vpack.c.bf16 %v119_v1, %v118_v0  ;;  %v2264_v4 = vld [vmem:[%s2953_s0 + $0x8] sm:$0xff]  ;;  %v2284_v8 = vld [vmem:[%s2953_s0 + $0x90] sm:$0xff] }
   0x3   :  { %1868 = vmatprep.mubr.msk.f32.mxu0 %vm127_vm0, %v2257_v2  ;;  %v2274_v6 = vld [vmem:[%s2953_s0 + $0x80] sm:$0xff]  ;;  %v2279_v7 = vld [vmem:[%s2953_s0 + $0x88] sm:$0xff]  ;;  %v2295_v9 = vld [vmem:[%s2953_s0 + $0x18] sm:$0xff] }
   0x4   :  { %2029 = vmatprep.subr.bf16.mxu0 %v2028_v3  ;;  %2048 = vmatprep.subr.bf16.mxu1 %v2028_v3  ;;  %v2302_v10 = vld [vmem:[%s2953_s0 + $0x20] sm:$0xff]  ;;  %v2309_v11 = vld [vmem:[%s2953_s0 + $0x98] sm:$0xff]  ;;  %v2321_v13 = vld [vmem:[%s2953_s0 + $0x28] sm:$0xff] }
   0x5   :  { %2031 = vmatpush3.bf16.msra.mxu0 %v2028_v3  ;;  %2049 = vmatpush3.bf16.msra.mxu1 %v2028_v3  ;;  %v2314_v12 = vld [vmem:[%s2953_s0 + $0xa0] sm:$0xff]  ;;  %v482_v15 = vld [vmem:[%s2956_s3 + $0x8] sm:$0xff]  ;;  %v483_v17 = vld [vmem:[%s2956_s3 + $0x10] sm:$0xff] }
   0x6   :  { %1892 = vmatprep.mubr.msk.f32.mxu1 %vm127_vm0, %v2274_v6  ;;  %v481_v14 = vld [vmem:[%s2956_s3] sm:$0xff]  ;;  %v484_v18 = vld [vmem:[%s2956_s3 + $0x18] sm:$0xff] }
   0x7   :  { %v2032_v16 = vpack.c.bf16 %v482_v15, %v481_v14 }
   0x8   :  { %1869 = vmatmul.mubr.msk.f32.vlgmr.msra.gmra.mrb[0].mxu0 %vm127_vm0, %v2264_v4  ;;  %1893 = vmatmul.mubr.msk.f32.vlgmr.msra.gmra.mrb[0].mxu1 %vm127_vm0, %v2279_v7 }
   0x9   :  { %1871 = vmatprep.mubr.msk.f32.mxu0 %vm127_vm0, %v2269_v5  ;;  %1895 = vmatprep.mubr.msk.f32.mxu1 %vm127_vm0, %v2284_v8 }
   0xc   :  { %1872 = vmatmul.mubr.msk.f32.gmra.mrb[2].mxu0 %vm127_vm0, %v2295_v9  ;;  %1896 = vmatmul.mubr.msk.f32.gmra.mrb[2].mxu1 %vm127_vm0, %v2309_v11 }
   0xd   :  { %1874 = vmatprep.mubr.msk.f32.mxu0 %vm127_vm0, %v2302_v10 }
   0xe   :  { %12 = vsyncpa [#allocation4], 0  ;;  %v2342_v19 = vld [vmem:[%s2953_s0 + $0x30] sm:$0xff]  ;;  %1898 = vmatprep.mubr.msk.f32.mxu1 %vm127_vm0, %v2314_v12  ;;  %v2349_v20 = vld [vmem:[%s2953_s0 + $0xa8] sm:$0xff]  ;;  %v2036_v21 = vpack.c.bf16 %v484_v18, %v483_v17  ;;  %2033 = vmatprep.subr.bf16.mxu1 %v2032_v16  ;;  %vm492_vm1 = vcmask 261120   ;;  %vm1370_vm2 = vcmask 31744  }
   0xf   :  { %v2354_v22 = vld [vmem:[%s2953_s0 + $0xb0] sm:$0xff]  ;;  %2035 = vmatpush3.bf16.msra.mxu1 %v2032_v16  ;;  %v2363_v23 = vld [vmem:[%s2953_s0 + $0x38] sm:$0xff]  ;;  %v2370_v24 = vld [vmem:[%s2953_s0 + $0x40] sm:$0xff]  ;;  %vm53_vm3 = vcmask 7168   ;;  %vm1637_vm4 = vcmask 0  }
  0x10   :  { %1875 = vmatmul.mubr.msk.f32.gmra.mrb[4].mxu0 %vm127_vm0, %v2321_v13  ;;  %1899 = vmatmul.mubr.msk.f32.gmra.mrb[4].mxu1 %vm127_vm0, %v2349_v20  ;;  %v2377_v25 = vld [vmem:[%s2953_s0 + $0xb8] sm:$0xff]  ;;  %v2382_v26 = vld [vmem:[%s2953_s0 + $0xc0] sm:$0xff]  ;;  %v2391_v27 = vld [vmem:[%s2953_s0 + $0x48] sm:$0xff] }
  0x11   :  { %1877 = vmatprep.mubr.msk.f32.mxu0 %vm127_vm0, %v2342_v19  ;;  %1901 = vmatprep.mubr.msk.f32.mxu1 %vm127_vm0, %v2354_v22  ;;  %v2398_v28 = vld [vmem:[%s2953_s0 + $0x50] sm:$0xff]  ;;  %v2405_v29 = vld [vmem:[%s2953_s0 + $0xc8] sm:$0xff]  ;;  %v2419_v31 = vld [vmem:[%s2953_s0 + $0x58] sm:$0xff] }
  0x12   :  { %2037 = vmatprep.subr.bf16.mxu1 %v2036_v21  ;;  %v2410_v30 = vld [vmem:[%s2953_s0 + $0xd0] sm:$0xff]  ;;  %v2426_v32 = vld [vmem:[%s2953_s0 + $0x60] sm:$0xff]  ;;  %v2433_v33 = vld [vmem:[%s2953_s0 + $0xd8] sm:$0xff] }
  0x13   :  { %2039 = vmatpush3.bf16.msra.mxu1 %v2036_v21  ;;  %v2438_v34 = vld [vmem:[%s2953_s0 + $0xe0] sm:$0xff]  ;;  %v2447_v35 = vld [vmem:[%s2953_s0 + $0x68] sm:$0xff]  ;;  %v2454_v36 = vld [vmem:[%s2953_s0 + $0x70] sm:$0xff] }
  0x14   :  { %1878 = vmatmul.mubr.msk.f32.gmra.mrb[6].mxu0 %vm127_vm0, %v2363_v23  ;;  %1902 = vmatmul.mubr.msk.f32.gmra.mrb[6].mxu1 %vm127_vm0, %v2377_v25  ;;  %v2461_v37 = vld [vmem:[%s2953_s0 + $0xe8] sm:$0xff]  ;;  %v2466_v38 = vld [vmem:[%s2953_s0 + $0xf0] sm:$0xff]  ;;  %v2475_v39 = vld [vmem:[%s2953_s0 + $0x78] sm:$0xff] }
  0x15   :  { %1880 = vmatprep.mubr.msk.f32.mxu0 %vm127_vm0, %v2370_v24  ;;  %1904 = vmatprep.mubr.msk.f32.mxu1 %vm127_vm0, %v2382_v26  ;;  %v2484_v40 = vld [vmem:[%s2953_s0 + $0xf8] sm:$0xff]  ;;  %v846_v41 = vld [vmem:[%s2958_s5] sm:$0xff]  ;;  %v847_v42 = vld [vmem:[%s2958_s5 + $0x8] sm:$0xff] }
  0x16   :  { %v848_v43 = vld [vmem:[%s2958_s5 + $0x10] sm:$0xff]  ;;  %v2040_v44 = vpack.c.bf16 %v847_v42, %v846_v41  ;;  %v849_v45 = vld [vmem:[%s2958_s5 + $0x18] sm:$0xff]  ;;  %v2505_v47 = vld [vmem:[%s2955_s2] ss:$0 sm:$0xff]  ;;  %s2205_s2 = smov 112  }
  0x17   :  { %v2044_v46 = vpack.c.bf16 %v849_v45, %v848_v43  ;;  %1178 = vrot.lane.b32.xlu0 %v2257_v2, %s2205_s2  ;;  %1182 = vrot.lane.b32.xlu1 %v2269_v5, %s2205_s2  ;;  %v2668_v2 = vld [vmem:[%s2957_s4] ss:$0 sm:$0xff] }
  0x18   :  { %1881 = vmatmul.mubr.msk.f32.gmra.mrb[8].mxu0 %vm127_vm0, %v2391_v27  ;;  %1905 = vmatmul.mubr.msk.f32.gmra.mrb[8].mxu1 %vm127_vm0, %v2405_v29 }
  0x19   :  { %1883 = vmatprep.mubr.msk.f32.mxu0 %vm127_vm0, %v2398_v28  ;;  %1907 = vmatprep.mubr.msk.f32.mxu1 %vm127_vm0, %v2410_v30 }
  0x1a   :  { %2041 = vmatprep.subr.bf16.mxu0 %v2040_v44 }
  0x1b   :  { %2043 = vmatpush3.bf16.msra.mxu0 %v2040_v44  ;;  %1180 = vrot.lane.b32.xlu0 %v2264_v4, %s2205_s2 }
  0x1c   :  { %1884 = vmatmul.mubr.msk.f32.gmra.mrb[10].mxu0 %vm127_vm0, %v2419_v31  ;;  %1908 = vmatmul.mubr.msk.f32.gmra.mrb[10].mxu1 %vm127_vm0, %v2433_v33 }
  0x1d   :  { %1886 = vmatprep.mubr.msk.f32.mxu0 %vm127_vm0, %v2426_v32  ;;  %1910 = vmatprep.mubr.msk.f32.mxu1 %vm127_vm0, %v2438_v34 }
  0x1e   :  { %2045 = vmatprep.subr.bf16.mxu0 %v2044_v46  ;;  %1184 = vrot.lane.b32.xlu1 %v2295_v9, %s2205_s2 }
  0x1f   :  { %2047 = vmatpush3.bf16.msra.mxu0 %v2044_v46  ;;  %1186 = vrot.lane.b32.xlu0 %v2302_v10, %s2205_s2 }
  0x20   :  { %1887 = vmatmul.mubr.msk.f32.gmra.mrb[12].mxu0 %vm127_vm0, %v2447_v35  ;;  %1911 = vmatmul.mubr.msk.f32.gmra.mrb[12].mxu1 %vm127_vm0, %v2461_v37 }
  0x21   :  { %1889 = vmatprep.mubr.msk.f32.mxu0 %vm127_vm0, %v2454_v36  ;;  %1913 = vmatprep.mubr.msk.f32.mxu1 %vm127_vm0, %v2466_v38 }
  0x22   :  { %1188 = vrot.lane.b32.xlu1 %v2321_v13, %s2205_s2 }
  0x23   :  { %1190 = vrot.lane.b32.xlu0 %v2342_v19, %s2205_s2 }
  0x24   :  { %1890 = vmatmul.mubr.msk.f32.gmra.mrb[14].mxu0 %vm127_vm0, %v2475_v39  ;;  %1914 = vmatmul.mubr.msk.f32.gmra.mrb[14].mxu1 %vm127_vm0, %v2484_v40 }
  0x26   :  { %1192 = vrot.lane.b32.xlu1 %v2363_v23, %s2205_s2 }
  0x27   :  { %1194 = vrot.lane.b32.xlu0 %v2370_v24, %s2205_s2 }
  0x2a   :  { %1196 = vrot.lane.b32.xlu1 %v2391_v27, %s2205_s2 }
  0x2b   :  { %1198 = vrot.lane.b32.xlu0 %v2398_v28, %s2205_s2 }
  0x2e   :  { %1200 = vrot.lane.b32.xlu1 %v2419_v31, %s2205_s2 }
  0x2f   :  { %1202 = vrot.lane.b32.xlu0 %v2426_v32, %s2205_s2 }
  0x32   :  { %1204 = vrot.lane.b32.xlu1 %v2447_v35, %s2205_s2 }
  0x33   :  { %1206 = vrot.lane.b32.xlu0 %v2454_v36, %s2205_s2 }
  0x36   :  { %1208 = vrot.lane.b32.xlu1 %v2475_v39, %s2205_s2 }
  0x37   :  { %1210 = vrot.lane.b32.xlu0 %v2274_v6, %s2205_s2 }
  0x3a   :  { %1212 = vrot.lane.b32.xlu1 %v2279_v7, %s2205_s2 }
  0x3b   :  { %1214 = vrot.lane.b32.xlu0 %v2284_v8, %s2205_s2 }
  0x3e   :  { %1216 = vrot.lane.b32.xlu1 %v2309_v11, %s2205_s2 }
  0x3f   :  { %1218 = vrot.lane.b32.xlu0 %v2314_v12, %s2205_s2 }
  0x42   :  { %1220 = vrot.lane.b32.xlu1 %v2349_v20, %s2205_s2 }
  0x43   :  { %1222 = vrot.lane.b32.xlu0 %v2354_v22, %s2205_s2 }
  0x46   :  { %1224 = vrot.lane.b32.xlu1 %v2377_v25, %s2205_s2 }
  0x47   :  { %1226 = vrot.lane.b32.xlu0 %v2382_v26, %s2205_s2 }
  0x4a   :  { %1228 = vrot.lane.b32.xlu1 %v2405_v29, %s2205_s2 }
  0x4b   :  { %1230 = vrot.lane.b32.xlu0 %v2410_v30, %s2205_s2 }
  0x4e   :  { %1232 = vrot.lane.b32.xlu1 %v2433_v33, %s2205_s2 }
  0x4f   :  { %1234 = vrot.lane.b32.xlu0 %v2438_v34, %s2205_s2 }
  0x52   :  { %1236 = vrot.lane.b32.xlu1 %v2461_v37, %s2205_s2 }
  0x53   :  { %1238 = vrot.lane.b32.xlu0 %v2466_v38, %s2205_s2 }
  0x56   :  { %1240 = vrot.lane.b32.xlu1 %v2484_v40, %s2205_s2 }
  0xdb   :  { %v1870_v48 = vpop.f32.mrb[0].mxu0  ;;  %v2508_v51 = vpop.f32.mrb[0].mxu1 }
  0xdc   :  { %v296_v49 = vadd.f32 %v1870_v48, %v2505_v47  ;;  %v290_v50 = vpop.f32.mrb[1].mxu0  ;;  %v2511_v53 = vpop.f32.mrb[1].mxu1 }
  0xdd   :  { %v291_v52 = vadd.f32 %v2505_v47, %v290_v50 }
  0xdf   :  { %2053 = vtanh.f32 %v291_v52  ;;  %v1873_v54 = vpop.f32.mrb[2].mxu0  ;;  %v2514_v57 = vpop.f32.mrb[2].mxu1 }
  0xe0   :  { %2055 = vtanh.f32 %v296_v49  ;;  %v306_v55 = vadd.f32 %v1873_v54, %v2505_v47  ;;  %v300_v56 = vpop.f32.mrb[3].mxu0  ;;  %v2517_v59 = vpop.f32.mrb[3].mxu1 }
  0xe1   :  { %v301_v58 = vadd.f32 %v2505_v47, %v300_v56 }
  0xe3   :  { %2057 = vtanh.f32 %v301_v58  ;;  %v1876_v60 = vpop.f32.mrb[4].mxu0  ;;  %v2520_v63 = vpop.f32.mrb[4].mxu1 }
  0xe4   :  { %2059 = vtanh.f32 %v306_v55  ;;  %v316_v61 = vadd.f32 %v1876_v60, %v2505_v47  ;;  %v310_v62 = vpop.f32.mrb[5].mxu0  ;;  %v2523_v1 = vpop.f32.mrb[5].mxu1 }
  0xe5   :  { %v311_v0 = vadd.f32 %v2505_v47, %v310_v62 }
  0xe6   :  { %2061 = vtanh.f32 %v316_v61 }
  0xe7   :  { %2063 = vtanh.f32 %v311_v0  ;;  %v1879_v3 = vpop.f32.mrb[6].mxu0  ;;  %v2526_v16 = vpop.f32.mrb[6].mxu1 }
  0xe8   :  { %v326_v14 = vadd.f32 %v1879_v3, %v2505_v47  ;;  %v320_v15 = vpop.f32.mrb[7].mxu0  ;;  %v2529_v21 = vpop.f32.mrb[7].mxu1 }
  0xe9   :  { %v2054_v17 = vpop.eup %2053  ;;  %v321_v18 = vadd.f32 %v2505_v47, %v320_v15 }
  0xea   :  { %v2056_v41 = vpop.eup %2055  ;;  %2065 = vtanh.f32 %v326_v14  ;;  %1924 = vmatprep.mubr.msk.f32.mxu1 %vm492_vm1, %v2054_v17 }
  0xeb   :  { %2067 = vtanh.f32 %v321_v18  ;;  %v1882_v42 = vpop.f32.mrb[8].mxu0  ;;  %1925 = vmatmul.mubr.msk.f32.vlgmr.msra.gmra.mrb[16].mxu1 %vm492_vm1, %v2056_v41  ;;  %v2534_v45 = vpop.f32.mrb[8].mxu1 }
  0xec   :  { %v336_v43 = vadd.f32 %v1882_v42, %v2505_v47  ;;  %v330_v44 = vpop.f32.mrb[9].mxu0  ;;  %v2537_v49 = vpop.f32.mrb[9].mxu1  ;;  %v371_v42 = vadd.f32 %v2505_v47, %v2511_v53  ;;  %v376_v53 = vadd.f32 %v2508_v51, %v2505_v47  ;;  %v391_v51 = vadd.f32 %v2505_v47, %v2523_v1 }
  0xed   :  { %v2058_v46 = vpop.eup %2057  ;;  %v331_v48 = vadd.f32 %v2505_v47, %v330_v44  ;;  %v406_v1 = vadd.f32 %v2526_v16, %v2505_v47 }
  0xee   :  { %v2060_v50 = vpop.eup %2059  ;;  %2069 = vtanh.f32 %v336_v43  ;;  %1927 = vmatprep.mubr.msk.f32.mxu1 %vm492_vm1, %v2058_v46 }
  0xef   :  { %2071 = vtanh.f32 %v331_v48  ;;  %v1885_v52 = vpop.f32.mrb[10].mxu0  ;;  %1928 = vmatmul.mubr.msk.f32.gmra.mrb[18].mxu1 %vm492_vm1, %v2060_v50  ;;  %v2542_v58 = vpop.f32.mrb[10].mxu1 }
  0xf0   :  { %v2062_v54 = vpop.eup %2061  ;;  %v346_v55 = vadd.f32 %v1885_v52, %v2505_v47  ;;  %v340_v56 = vpop.f32.mrb[11].mxu0 }
  0xf1   :  { %v2064_v60 = vpop.eup %2063  ;;  %v341_v61 = vadd.f32 %v2505_v47, %v340_v56  ;;  %v2545_v62 = vpop.f32.mrb[11].mxu1 }
  0xf2   :  { %2073 = vtanh.f32 %v346_v55  ;;  %1930 = vmatprep.mubr.msk.f32.mxu1 %vm492_vm1, %v2064_v60  ;;  %v381_v60 = vadd.f32 %v2505_v47, %v2517_v59  ;;  %v396_v59 = vadd.f32 %v2520_v63, %v2505_v47  ;;  %v411_v63 = vadd.f32 %v2505_v47, %v2537_v49 }
  0xf3   :  { %2075 = vtanh.f32 %v341_v61  ;;  %v1888_v0 = vpop.f32.mrb[12].mxu0  ;;  %1931 = vmatmul.mubr.msk.f32.gmra.mrb[20].mxu1 %vm492_vm1, %v2062_v54  ;;  %v2550_v17 = vpop.f32.mrb[12].mxu1  ;;  %v421_v16 = vadd.f32 %v2505_v47, %v2545_v62  ;;  %v426_v49 = vadd.f32 %v2542_v58, %v2505_v47 }
  0xf4   :  { %v2066_v3 = vpop.eup %2065  ;;  %v356_v14 = vadd.f32 %v1888_v0, %v2505_v47  ;;  %v350_v15 = vpop.f32.mrb[13].mxu0  ;;  %v436_v62 = vadd.f32 %v2550_v17, %v2505_v47 }
  0xf5   :  { %v2068_v18 = vpop.eup %2067  ;;  %v351_v41 = vadd.f32 %v2505_v47, %v350_v15  ;;  %v430_v43 = vpop.f32.mrb[13].mxu1 }
  0xf6   :  { %2077 = vtanh.f32 %v356_v14  ;;  %1933 = vmatprep.mubr.msk.f32.mxu1 %vm492_vm1, %v2068_v18 }
  0xf7   :  { %2079 = vtanh.f32 %v351_v41  ;;  %v1891_v44 = vpop.f32.mrb[14].mxu0  ;;  %1934 = vmatmul.mubr.msk.f32.gmra.mrb[22].mxu1 %vm492_vm1, %v2066_v3  ;;  %v2558_v52 = vpop.f32.mrb[14].mxu1  ;;  %v386_v3 = vadd.f32 %v2514_v57, %v2505_v47  ;;  %v401_v57 = vadd.f32 %v2505_v47, %v2529_v21  ;;  %v416_v21 = vadd.f32 %v2534_v45, %v2505_v47 }
  0xf8   :  { %v2070_v46 = vpop.eup %2069  ;;  %v366_v48 = vadd.f32 %v1891_v44, %v2505_v47  ;;  %v360_v50 = vpop.f32.mrb[15].mxu0  ;;  %2081 = vtanh.f32 %v371_v42 }
  0xf9   :  { %v2072_v54 = vpop.eup %2071  ;;  %v361_v55 = vadd.f32 %v2505_v47, %v360_v50  ;;  %v440_v56 = vpop.f32.mrb[15].mxu1 }
  0xfa   :  { %2083 = vtanh.f32 %v366_v48  ;;  %1936 = vmatprep.mubr.msk.f32.mxu1 %vm492_vm1, %v2072_v54  ;;  %v431_v54 = vadd.f32 %v2505_v47, %v430_v43  ;;  %v446_v43 = vadd.f32 %v2558_v52, %v2505_v47 }
  0xfb   :  { %2085 = vtanh.f32 %v361_v55  ;;  %1937 = vmatmul.mubr.msk.f32.gmra.mrb[24].mxu1 %vm492_vm1, %v2070_v46 }
  0xfc   :  { %v2074_v61 = vpop.eup %2073  ;;  %2087 = vtanh.f32 %v376_v53  ;;  %v441_v53 = vadd.f32 %v2505_v47, %v440_v56 }
  0xfd   :  { %v2076_v0 = vpop.eup %2075  ;;  %2089 = vtanh.f32 %v381_v60 }
  0xfe   :  { %1939 = vmatprep.mubr.msk.f32.mxu1 %vm492_vm1, %v2076_v0  ;;  %2091 = vtanh.f32 %v386_v3 }
  0xff   :  { %1940 = vmatmul.mubr.msk.f32.gmra.mrb[26].mxu1 %vm492_vm1, %v2074_v61  ;;  %2093 = vtanh.f32 %v391_v51 }
 0x100   :  { %v2078_v14 = vpop.eup %2077  ;;  %2095 = vtanh.f32 %v396_v59 }
 0x101   :  { %v2080_v15 = vpop.eup %2079  ;;  %2097 = vtanh.f32 %v401_v57 }
 0x102   :  { %1942 = vmatprep.mubr.msk.f32.mxu1 %vm492_vm1, %v2080_v15  ;;  %v2082_v18 = vpop.eup %2081  ;;  %2099 = vtanh.f32 %v406_v1 }
 0x103   :  { %1943 = vmatmul.mubr.msk.f32.gmra.mrb[28].mxu1 %vm492_vm1, %v2078_v14  ;;  %2101 = vtanh.f32 %v411_v63 }
 0x104   :  { %v2084_v41 = vpop.eup %2083  ;;  %2103 = vtanh.f32 %v416_v21 }
 0x105   :  { %v2086_v42 = vpop.eup %2085  ;;  %2105 = vtanh.f32 %v421_v16 }
 0x106   :  { %1945 = vmatprep.mubr.msk.f32.mxu1 %vm492_vm1, %v2086_v42  ;;  %v2088_v44 = vpop.eup %2087  ;;  %2107 = vtanh.f32 %v426_v49 }
 0x107   :  { %1946 = vmatmul.mubr.msk.f32.gmra.mrb[30].mxu1 %vm492_vm1, %v2084_v41  ;;  %v2090_v46 = vpop.eup %2089  ;;  %2109 = vtanh.f32 %v431_v54 }
 0x108   :  { %1948 = vmatprep.mubr.msk.f32.mxu1 %vm492_vm1, %v2082_v18  ;;  %v2092_v48 = vpop.eup %2091  ;;  %2111 = vtanh.f32 %v436_v62 }
 0x109   :  { %v2094_v50 = vpop.eup %2093  ;;  %2113 = vtanh.f32 %v441_v53 }
 0x10a   :  { %v2096_v45 = vpop.eup %2095  ;;  %2115 = vtanh.f32 %v446_v43 }
 0x10b   :  { %1949 = vmatmul.mubr.msk.f32.gmra.mrb[32].mxu1 %vm492_vm1, %v2088_v44  ;;  %v2098_v55 = vpop.eup %2097 }
 0x10c   :  { %1951 = vmatprep.mubr.msk.f32.mxu1 %vm492_vm1, %v2090_v46  ;;  %v2100_v60 = vpop.eup %2099 }
 0x10d   :  { %v2102_v58 = vpop.eup %2101 }
 0x10e   :  { %v2104_v61 = vpop.eup %2103 }
 0x10f   :  { %1952 = vmatmul.mubr.msk.f32.gmra.mrb[34].mxu1 %vm492_vm1, %v2092_v48  ;;  %v2106_v17 = vpop.eup %2105 }
 0x110   :  { %1954 = vmatprep.mubr.msk.f32.mxu1 %vm492_vm1, %v2094_v50  ;;  %v2108_v0 = vpop.eup %2107 }
 0x111   :  { %v2110_v56 = vpop.eup %2109 }
 0x112   :  { %v2112_v3 = vpop.eup %2111 }
 0x113   :  { %1955 = vmatmul.mubr.msk.f32.gmra.mrb[36].mxu1 %vm492_vm1, %v2096_v45  ;;  %v2114_v47 = vpop.eup %2113 }
 0x114   :  { %1957 = vmatprep.mubr.msk.f32.mxu1 %vm492_vm1, %v2098_v55  ;;  %v2116_v52 = vpop.eup %2115 }
 0x117   :  { %1958 = vmatmul.mubr.msk.f32.gmra.mrb[38].mxu1 %vm492_vm1, %v2100_v60 }
 0x118   :  { %1960 = vmatprep.mubr.msk.f32.mxu1 %vm492_vm1, %v2102_v58 }
 0x11b   :  { %1961 = vmatmul.mubr.msk.f32.gmra.mrb[40].mxu1 %vm492_vm1, %v2104_v61 }
 0x11c   :  { %1963 = vmatprep.mubr.msk.f32.mxu1 %vm492_vm1, %v2106_v17 }
 0x11f   :  { %1964 = vmatmul.mubr.msk.f32.gmra.mrb[42].mxu1 %vm492_vm1, %v2108_v0 }
 0x120   :  { %1966 = vmatprep.mubr.msk.f32.mxu1 %vm492_vm1, %v2110_v56 }
 0x123   :  { %1967 = vmatmul.mubr.msk.f32.gmra.mrb[44].mxu1 %vm492_vm1, %v2112_v3 }
 0x124   :  { %1969 = vmatprep.mubr.msk.f32.mxu1 %vm492_vm1, %v2114_v47 }
 0x127   :  { %1970 = vmatmul.mubr.msk.f32.gmra.mrb[46].mxu1 %vm492_vm1, %v2116_v52 }
 0x1be   :  { %v1926_v4 = vpop.f32.mrb[16].mxu1 }
 0x1bf   :  { %v661_v5 = vadd.f32 %v1926_v4, %v2668_v2  ;;  %v655_v6 = vpop.f32.mrb[17].mxu1 }
 0x1c0   :  { %v656_v7 = vadd.f32 %v2668_v2, %v655_v6 }
 0x1c2   :  { %2117 = vtanh.f32 %v656_v7  ;;  %v1929_v8 = vpop.f32.mrb[18].mxu1 }
 0x1c3   :  { %2119 = vtanh.f32 %v661_v5  ;;  %v671_v9 = vadd.f32 %v1929_v8, %v2668_v2  ;;  %v665_v10 = vpop.f32.mrb[19].mxu1 }
 0x1c4   :  { %v666_v11 = vadd.f32 %v2668_v2, %v665_v10 }
 0x1c6   :  { %2121 = vtanh.f32 %v666_v11  ;;  %v1932_v12 = vpop.f32.mrb[20].mxu1 }
 0x1c7   :  { %2123 = vtanh.f32 %v671_v9  ;;  %v681_v13 = vadd.f32 %v1932_v12, %v2668_v2  ;;  %v675_v19 = vpop.f32.mrb[21].mxu1 }
 0x1c8   :  { %v676_v20 = vadd.f32 %v2668_v2, %v675_v19 }
 0x1ca   :  { %2125 = vtanh.f32 %v676_v20  ;;  %v1935_v22 = vpop.f32.mrb[22].mxu1 }
 0x1cb   :  { %2127 = vtanh.f32 %v681_v13  ;;  %v691_v23 = vadd.f32 %v1935_v22, %v2668_v2  ;;  %v685_v24 = vpop.f32.mrb[23].mxu1 }
 0x1cc   :  { %v2118_v25 = vpop.eup %2117  ;;  %v686_v26 = vadd.f32 %v2668_v2, %v685_v24 }
 0x1cd   :  { %v2120_v27 = vpop.eup %2119  ;;  %1980 = vmatprep.mubr.msk.f32.mxu0 %vm492_vm1, %v2118_v25 }
 0x1ce   :  { %2129 = vtanh.f32 %v686_v26  ;;  %v1938_v28 = vpop.f32.mrb[24].mxu1  ;;  %1981 = vmatmul.mubr.msk.f32.vlgmr.msra.gmra.mrb[16].mxu0 %vm492_vm1, %v2120_v27 }
 0x1cf   :  { %2131 = vtanh.f32 %v691_v23  ;;  %v701_v29 = vadd.f32 %v1938_v28, %v2668_v2  ;;  %v695_v30 = vpop.f32.mrb[25].mxu1 }
 0x1d0   :  { %v2122_v31 = vpop.eup %2121  ;;  %v696_v32 = vadd.f32 %v2668_v2, %v695_v30 }
 0x1d1   :  { %v2124_v33 = vpop.eup %2123  ;;  %1983 = vmatprep.mubr.msk.f32.mxu0 %vm492_vm1, %v2122_v31 }
 0x1d2   :  { %2133 = vtanh.f32 %v696_v32  ;;  %v1941_v34 = vpop.f32.mrb[26].mxu1  ;;  %1984 = vmatmul.mubr.msk.f32.gmra.mrb[18].mxu0 %vm492_vm1, %v2124_v33 }
 0x1d3   :  { %2135 = vtanh.f32 %v701_v29  ;;  %v711_v35 = vadd.f32 %v1941_v34, %v2668_v2  ;;  %v705_v36 = vpop.f32.mrb[27].mxu1 }
 0x1d4   :  { %v2126_v37 = vpop.eup %2125  ;;  %v706_v38 = vadd.f32 %v2668_v2, %v705_v36 }
 0x1d5   :  { %v2128_v39 = vpop.eup %2127  ;;  %1986 = vmatprep.mubr.msk.f32.mxu0 %vm492_vm1, %v2126_v37 }
 0x1d6   :  { %2137 = vtanh.f32 %v706_v38  ;;  %v1944_v40 = vpop.f32.mrb[28].mxu1  ;;  %1987 = vmatmul.mubr.msk.f32.gmra.mrb[20].mxu0 %vm492_vm1, %v2128_v39 }
 0x1d7   :  { %2139 = vtanh.f32 %v711_v35  ;;  %v721_v51 = vadd.f32 %v1944_v40, %v2668_v2  ;;  %v715_v14 = vpop.f32.mrb[29].mxu1 }
 0x1d8   :  { %v2130_v15 = vpop.eup %2129  ;;  %v716_v59 = vadd.f32 %v2668_v2, %v715_v14  ;;  %v1183_v14 = vpop.permute.xlu1 %1182 }
 0x1d9   :  { %v2132_v18 = vpop.eup %2131  ;;  %1989 = vmatprep.mubr.msk.f32.mxu0 %vm492_vm1, %v2130_v15  ;;  %v1179_v15 = vpop.permute.xlu0 %1178 }
 0x1da   :  { %2141 = vtanh.f32 %v716_v59  ;;  %v1947_v57 = vpop.f32.mrb[30].mxu1  ;;  %1990 = vmatmul.mubr.msk.f32.gmra.mrb[22].mxu0 %vm492_vm1, %v2132_v18 }
 0x1db   :  { %2143 = vtanh.f32 %v721_v51  ;;  %v731_v41 = vadd.f32 %v1947_v57, %v2668_v2  ;;  %v725_v42 = vpop.f32.mrb[31].mxu1 }
 0x1dc   :  { %v2134_v1 = vpop.eup %2133  ;;  %v726_v63 = vadd.f32 %v2668_v2, %v725_v42  ;;  %v1185_v59 = vpop.permute.xlu1 %1184 }
 0x1dd   :  { %v2136_v44 = vpop.eup %2135  ;;  %1992 = vmatprep.mubr.msk.f32.mxu0 %vm492_vm1, %v2134_v1  ;;  %v1181_v18 = vpop.permute.xlu0 %1180 }
 0x1de   :  { %2145 = vtanh.f32 %v726_v63  ;;  %v1950_v46 = vpop.f32.mrb[32].mxu1  ;;  %1993 = vmatmul.mubr.msk.f32.gmra.mrb[24].mxu0 %vm492_vm1, %v2136_v44 }
 0x1df   :  { %2147 = vtanh.f32 %v731_v41  ;;  %v741_v21 = vadd.f32 %v1950_v46, %v2668_v2  ;;  %v735_v16 = vpop.f32.mrb[33].mxu1  ;;  %v2757_v46 = vld [vmem:[%s2959_s6] ss:$0 sm:$0xff]  ;;  %s2207_s6 = smov [#allocation3]  }
 0x1e0   :  { %v2138_v48 = vpop.eup %2137  ;;  %v736_v50 = vadd.f32 %v2668_v2, %v735_v16  ;;  %v1189_v57 = vpop.permute.xlu1 %1188  ;;  %s1645_s13 = sshll.u32 %s2207_s6, 4  ;;  %s1646_s13 = int_to_ptr.vmem [resolvable:$true] %s1645_s13 }
 0x1e1   :  { %v2140_v49 = vpop.eup %2139  ;;  %1995 = vmatprep.mubr.msk.f32.mxu0 %vm492_vm1, %v2138_v48  ;;  %v1187_v41 = vpop.permute.xlu0 %1186  ;;  %s2181_s14 = scalar_lea.vmem %s1646_s13, 16  ;;  %s2185_s15 = scalar_lea.vmem %s1646_s13, 32 }
 0x1e2   :  { %2149 = vtanh.f32 %v736_v50  ;;  %v1953_v54 = vpop.f32.mrb[34].mxu1  ;;  %1996 = vmatmul.mubr.msk.f32.gmra.mrb[26].mxu0 %vm492_vm1, %v2140_v49  ;;  %p2182_p0 = scmp.ne.s32.totalorder %s1646_s13, %s2181_s14  ;;  %p2186_p1 = scmp.lt.s32.totalorder %s1646_s13, %s1646_s13 }
 0x1e3   :  { %2151 = vtanh.f32 %v741_v21  ;;  %v751_v45 = vadd.f32 %v1953_v54, %v2668_v2  ;;  %v745_v55 = vpop.f32.mrb[35].mxu1  ;;  %p2187_p2 = scmp.lt.s32.totalorder %s2185_s15, %s2181_s14 }
 0x1e4   :  { %v2142_v62 = vpop.eup %2141  ;;  %v746_v53 = vadd.f32 %v2668_v2, %v745_v55  ;;  %v2746_v42 = vpop.permute.xlu1 %1192 }
 0x1e5   :  { %v2144_v60 = vpop.eup %2143  ;;  %1998 = vmatprep.mubr.msk.f32.mxu0 %vm492_vm1, %v2142_v62  ;;  %v2748_v1 = vpop.permute.xlu0 %1190  ;;  %p2188_p3 = por %p2187_p2, %p2186_p1 }
 0x1e6   :  { %2153 = vtanh.f32 %v746_v53  ;;  %v1956_v58 = vpop.f32.mrb[36].mxu1  ;;  %1999 = vmatmul.mubr.msk.f32.gmra.mrb[28].mxu0 %vm492_vm1, %v2144_v60 }
 0x1e7   :  { %2155 = vtanh.f32 %v751_v45  ;;  %v761_v43 = vadd.f32 %v1956_v58, %v2668_v2  ;;  %v755_v61 = vpop.f32.mrb[37].mxu1  ;;  %p2189_p4 = pnand %p2188_p3, %p2182_p0 }
 0x1e8   :  { %v2146_v17 = vpop.eup %2145  ;;  %v756_v0 = vadd.f32 %v2668_v2, %v755_v61  ;;  %v2750_v63 = vpop.permute.xlu1 %1196 }
 0x1e9   :  { %v2148_v56 = vpop.eup %2147  ;;  %2001 = vmatprep.mubr.msk.f32.mxu0 %vm492_vm1, %v2146_v17  ;;  %v2752_v44 = vpop.permute.xlu0 %1194 }
 0x1ea   :  { %2157 = vtanh.f32 %v756_v0  ;;  %v1959_v3 = vpop.f32.mrb[38].mxu1  ;;  %2002 = vmatmul.mubr.msk.f32.gmra.mrb[30].mxu0 %vm492_vm1, %v2148_v56 }
 0x1eb   :  { %2159 = vtanh.f32 %v761_v43  ;;  %v771_v47 = vadd.f32 %v1959_v3, %v2668_v2  ;;  %v765_v52 = vpop.f32.mrb[39].mxu1 }
 0x1ec   :  { %v2150_v4 = vpop.eup %2149  ;;  %v766_v5 = vadd.f32 %v2668_v2, %v765_v52  ;;  %v2759_v16 = vpop.permute.xlu1 %1200 }
 0x1ed   :  { %v2152_v6 = vpop.eup %2151  ;;  %2004 = vmatprep.mubr.msk.f32.mxu0 %vm492_vm1, %v2150_v4  ;;  %v2762_v49 = vpop.permute.xlu0 %1198 }
 0x1ee   :  { %2161 = vtanh.f32 %v766_v5  ;;  %v1962_v7 = vpop.f32.mrb[40].mxu1  ;;  %2005 = vmatmul.mubr.msk.f32.gmra.mrb[32].mxu0 %vm492_vm1, %v2152_v6 }
 0x1ef   :  { %2163 = vtanh.f32 %v771_v47  ;;  %v781_v8 = vadd.f32 %v1962_v7, %v2668_v2  ;;  %v775_v9 = vpop.f32.mrb[41].mxu1 }
 0x1f0   :  { %v2154_v10 = vpop.eup %2153  ;;  %v776_v11 = vadd.f32 %v2668_v2, %v775_v9  ;;  %v2767_v17 = vpop.permute.xlu1 %1204 }
 0x1f1   :  { %v2156_v12 = vpop.eup %2155  ;;  %2007 = vmatprep.mubr.msk.f32.mxu0 %vm492_vm1, %v2154_v10  ;;  %v2770_v56 = vpop.permute.xlu0 %1202 }
 0x1f2   :  { %2165 = vtanh.f32 %v776_v11  ;;  %v1965_v13 = vpop.f32.mrb[42].mxu1  ;;  %2008 = vmatmul.mubr.msk.f32.gmra.mrb[34].mxu0 %vm492_vm1, %v2156_v12 }
 0x1f3   :  { %2167 = vtanh.f32 %v781_v8  ;;  %v791_v19 = vadd.f32 %v1965_v13, %v2668_v2  ;;  %v785_v20 = vpop.f32.mrb[43].mxu1 }
 0x1f4   :  { %v2158_v22 = vpop.eup %2157  ;;  %v786_v23 = vadd.f32 %v2668_v2, %v785_v20 }
 0x1f5   :  { %v2160_v24 = vpop.eup %2159  ;;  %2010 = vmatprep.mubr.msk.f32.mxu0 %vm492_vm1, %v2158_v22 }
 0x1f6   :  { %2169 = vtanh.f32 %v786_v23  ;;  %v1968_v25 = vpop.f32.mrb[44].mxu1  ;;  %2011 = vmatmul.mubr.msk.f32.gmra.mrb[36].mxu0 %vm492_vm1, %v2160_v24  ;;  %v2779_v23 = vpop.permute.xlu0 %1206 }
 0x1f7   :  { %2171 = vtanh.f32 %v791_v19  ;;  %v801_v26 = vadd.f32 %v1968_v25, %v2668_v2  ;;  %v795_v27 = vpop.f32.mrb[45].mxu1  ;;  %v2776_v19 = vpop.permute.xlu1 %1208 }
 0x1f8   :  { %v2162_v28 = vpop.eup %2161  ;;  %v796_v29 = vadd.f32 %v2668_v2, %v795_v27 }
 0x1f9   :  { %v2164_v30 = vpop.eup %2163  ;;  %2013 = vmatprep.mubr.msk.f32.mxu0 %vm492_vm1, %v2162_v28 }
 0x1fa   :  { %2173 = vtanh.f32 %v796_v29  ;;  %v1971_v31 = vpop.f32.mrb[46].mxu1  ;;  %2014 = vmatmul.mubr.msk.f32.gmra.mrb[38].mxu0 %vm492_vm1, %v2164_v30 }
 0x1fb   :  { %2175 = vtanh.f32 %v801_v26  ;;  %v811_v32 = vadd.f32 %v1971_v31, %v2668_v2  ;;  %v805_v33 = vpop.f32.mrb[47].mxu1  ;;  %v2206_v26 = vmov 0.0  }
 0x1fc   :  { %v2166_v34 = vpop.eup %2165  ;;  %v806_v35 = vadd.f32 %v2668_v2, %v805_v33  ;;  %55 = vst.msk [vmem:[#allocation2 + $0x8] sm:$0xff] %vm53_vm3, %v2206_v26  ;;  %54 = vst.msk [vmem:[#allocation2] sm:$0xff] %vm53_vm3, %v2206_v26 }
 0x1fd   :  { %v2168_v36 = vpop.eup %2167  ;;  %2016 = vmatprep.mubr.msk.f32.mxu0 %vm492_vm1, %v2166_v34  ;;  %56 = vst.msk [vmem:[#allocation2 + $0x10] sm:$0xff] %vm53_vm3, %v2206_v26  ;;  %57 = vst.msk [vmem:[#allocation2 + $0x18] sm:$0xff] %vm53_vm3, %v2206_v26 }
 0x1fe   :  { %2177 = vtanh.f32 %v806_v35  ;;  %2017 = vmatmul.mubr.msk.f32.gmra.mrb[40].mxu0 %vm492_vm1, %v2168_v36  ;;  %58 = vst.msk [vmem:[#allocation2 + $0x20] sm:$0xff] %vm53_vm3, %v2206_v26  ;;  %59 = vst.msk [vmem:[#allocation2 + $0x28] sm:$0xff] %vm53_vm3, %v2206_v26 }
 0x1ff   :  { %2179 = vtanh.f32 %v811_v32  ;;  %60 = vst.msk [vmem:[#allocation2 + $0x30] sm:$0xff] %vm53_vm3, %v2206_v26  ;;  %61 = vst.msk [vmem:[#allocation2 + $0x38] sm:$0xff] %vm53_vm3, %v2206_v26 }
 0x200   :  { %v2170_v37 = vpop.eup %2169  ;;  %62 = vst.msk [vmem:[#allocation2 + $0x40] sm:$0xff] %vm53_vm3, %v2206_v26  ;;  %63 = vst.msk [vmem:[#allocation2 + $0x48] sm:$0xff] %vm53_vm3, %v2206_v26 }
 0x201   :  { %v2172_v38 = vpop.eup %2171  ;;  %2019 = vmatprep.mubr.msk.f32.mxu0 %vm492_vm1, %v2170_v37  ;;  %64 = vst.msk [vmem:[#allocation2 + $0x50] sm:$0xff] %vm53_vm3, %v2206_v26  ;;  %65 = vst.msk [vmem:[#allocation2 + $0x58] sm:$0xff] %vm53_vm3, %v2206_v26  ;;  %v1213_v37 = vpop.permute.xlu1 %1212 }
 0x202   :  { %2020 = vmatmul.mubr.msk.f32.gmra.mrb[42].mxu0 %vm492_vm1, %v2172_v38  ;;  %66 = vst.msk [vmem:[#allocation2 + $0x60] sm:$0xff] %vm53_vm3, %v2206_v26  ;;  %67 = vst.msk [vmem:[#allocation2 + $0x68] sm:$0xff] %vm53_vm3, %v2206_v26 }
 0x203   :  { %68 = vst.msk [vmem:[#allocation2 + $0x70] sm:$0xff] %vm53_vm3, %v2206_v26  ;;  %69 = vst.msk [vmem:[#allocation2 + $0x78] sm:$0xff] %vm53_vm3, %v2206_v26 }
 0x204   :  { %v2174_v39 = vpop.eup %2173  ;;  %70 = vst.msk [vmem:[#allocation2 + $0x80] sm:$0xff] %vm53_vm3, %v2206_v26  ;;  %71 = vst.msk [vmem:[#allocation2 + $0x88] sm:$0xff] %vm53_vm3, %v2206_v26 }
 0x205   :  { %v2176_v40 = vpop.eup %2175  ;;  %2022 = vmatprep.mubr.msk.f32.mxu0 %vm492_vm1, %v2174_v39  ;;  %72 = vst.msk [vmem:[#allocation2 + $0x90] sm:$0xff] %vm53_vm3, %v2206_v26  ;;  %73 = vst.msk [vmem:[#allocation2 + $0x98] sm:$0xff] %vm53_vm3, %v2206_v26  ;;  %v1211_v39 = vpop.permute.xlu0 %1210 }
 0x206   :  { %2023 = vmatmul.mubr.msk.f32.gmra.mrb[44].mxu0 %vm492_vm1, %v2176_v40  ;;  %74 = vst.msk [vmem:[#allocation2 + $0xa0] sm:$0xff] %vm53_vm3, %v2206_v26  ;;  %75 = vst.msk [vmem:[#allocation2 + $0xa8] sm:$0xff] %vm53_vm3, %v2206_v26 }
 0x207   :  { %76 = vst.msk [vmem:[#allocation2 + $0xb0] sm:$0xff] %vm53_vm3, %v2206_v26  ;;  %77 = vst.msk [vmem:[#allocation2 + $0xb8] sm:$0xff] %vm53_vm3, %v2206_v26 }
 0x208   :  { %v2178_v2 = vpop.eup %2177  ;;  %78 = vst.msk [vmem:[#allocation2 + $0xc0] sm:$0xff] %vm53_vm3, %v2206_v26  ;;  %79 = vst.msk [vmem:[#allocation2 + $0xc8] sm:$0xff] %vm53_vm3, %v2206_v26 }
 0x209   :  { %v2180_v51 = vpop.eup %2179  ;;  %2025 = vmatprep.mubr.msk.f32.mxu0 %vm492_vm1, %v2178_v2  ;;  %80 = vst.msk [vmem:[#allocation2 + $0xd0] sm:$0xff] %vm53_vm3, %v2206_v26  ;;  %81 = vst.msk [vmem:[#allocation2 + $0xd8] sm:$0xff] %vm53_vm3, %v2206_v26 }
 0x20a   :  { %2026 = vmatmul.mubr.msk.f32.gmra.mrb[46].mxu0 %vm492_vm1, %v2180_v51  ;;  %82 = vst.msk [vmem:[#allocation2 + $0xe0] sm:$0xff] %vm53_vm3, %v2206_v26  ;;  %83 = vst.msk [vmem:[#allocation2 + $0xe8] sm:$0xff] %vm53_vm3, %v2206_v26 }
 0x20b   :  { %84 = vst.msk [vmem:[#allocation2 + $0xf0] sm:$0xff] %vm53_vm3, %v2206_v26  ;;  %85 = vst.msk [vmem:[#allocation2 + $0xf8] sm:$0xff] %vm53_vm3, %v2206_v26 }
 0x2a1   :  { %v1982_v21 = vpop.f32.mrb[16].mxu0 }
 0x2a2   :  { %v1025_v48 = vadd.f32 %v1982_v21, %v2757_v46  ;;  %v1019_v50 = vpop.f32.mrb[17].mxu0 }
 0x2a3   :  { %v1020_v54 = vadd.f32 %v2757_v46, %v1019_v50  ;;  %v1217_v50 = vpop.permute.xlu1 %1216 }
 0x2a4   :  { %v1275_v45 = vsub.f32 %v1025_v48, %v1181_v18 }
 0x2a5   :  { %v1274_v55 = vsub.f32 %v1020_v54, %v1179_v15  ;;  %v1985_v62 = vpop.f32.mrb[18].mxu0 }
 0x2a6   :  { %v1339_v53 = vmul.f32 %v1275_v45, %v1275_v45  ;;  %v1035_v60 = vadd.f32 %v1985_v62, %v2757_v46  ;;  %v1029_v58 = vpop.f32.mrb[19].mxu0 }
 0x2a7   :  { %v1030_v43 = vadd.f32 %v2757_v46, %v1029_v58  ;;  %v1338_v61 = vmul.f32 %v1274_v55, %v1274_v55  ;;  %v1215_v55 = vpop.permute.xlu0 %1214 }
 0x2a8   :  { %v1374_v0 = vsel %vm1370_vm2, %v1339_v53, 0.0  ;;  %v1277_v47 = vsub.f32 %v1035_v60, %v1185_v59 }
 0x2a9   :  { %v1276_v3 = vsub.f32 %v1030_v43, %v1183_v14  ;;  %1375 = vadd.xlane.f32.xlu1 %v1374_v0  ;;  %v1988_v52 = vpop.f32.mrb[20].mxu0  ;;  %v1371_v4 = vsel %vm1370_vm2, %v1338_v61, 0.0 }
 0x2aa   :  { %v1045_v5 = vadd.f32 %v1988_v52, %v2757_v46  ;;  %v1039_v6 = vpop.f32.mrb[21].mxu0  ;;  %1372 = vadd.xlane.f32.xlu0 %v1371_v4  ;;  %v1341_v9 = vmul.f32 %v1277_v47, %v1277_v47  ;;  %v1221_v4 = vpop.permute.xlu1 %1220 }
 0x2ab   :  { %v1040_v7 = vadd.f32 %v2757_v46, %v1039_v6  ;;  %v1340_v8 = vmul.f32 %v1276_v3, %v1276_v3  ;;  %v1219_v6 = vpop.permute.xlu0 %1218 }
 0x2ac   :  { %v1279_v10 = vsub.f32 %v1045_v5, %v1189_v57  ;;  %v1380_v32 = vsel %vm1370_vm2, %v1341_v9, 0.0 }
 0x2ad   :  { %v1278_v11 = vsub.f32 %v1040_v7, %v1187_v41  ;;  %v1991_v12 = vpop.f32.mrb[22].mxu0  ;;  %v1377_v13 = vsel %vm1370_vm2, %v1340_v8, 0.0 }
 0x2ae   :  { %v1055_v20 = vadd.f32 %v1991_v12, %v2757_v46  ;;  %v1049_v22 = vpop.f32.mrb[23].mxu0  ;;  %1378 = vadd.xlane.f32.xlu0 %v1377_v13  ;;  %v1343_v28 = vmul.f32 %v1279_v10, %v1279_v10  ;;  %v1225_v26 = vpop.permute.xlu1 %1224 }
 0x2af   :  { %v1342_v24 = vmul.f32 %v1278_v11, %v1278_v11  ;;  %v1050_v25 = vadd.f32 %v2757_v46, %v1049_v22 }
 0x2b0   :  { %v1281_v27 = vsub.f32 %v1055_v20, %v2746_v42  ;;  %v1386_v15 = vsel %vm1370_vm2, %v1343_v28, 0.0 }
 0x2b1   :  { %v1280_v29 = vsub.f32 %v1050_v25, %v2748_v1  ;;  %v1994_v30 = vpop.f32.mrb[24].mxu0  ;;  %v1383_v31 = vsel %vm1370_vm2, %v1342_v24, 0.0 }
 0x2b2   :  { %v1065_v33 = vadd.f32 %v1994_v30, %v2757_v46  ;;  %v1059_v34 = vpop.f32.mrb[25].mxu0  ;;  %1384 = vadd.xlane.f32.xlu1 %v1383_v31  ;;  %1381 = vadd.xlane.f32.xlu0 %v1380_v32  ;;  %v1345_v38 = vmul.f32 %v1281_v27, %v1281_v27 }
 0x2b3   :  { %v1344_v35 = vmul.f32 %v1280_v29, %v1280_v29  ;;  %v1060_v36 = vadd.f32 %v2757_v46, %v1059_v34  ;;  %v1223_v29 = vpop.permute.xlu0 %1222 }
 0x2b4   :  { %v1283_v40 = vsub.f32 %v1065_v33, %v2750_v63  ;;  %v1392_v42 = vsel %vm1370_vm2, %v1345_v38, 0.0 }
 0x2b5   :  { %v1282_v2 = vsub.f32 %v1060_v36, %v2752_v44  ;;  %v1997_v51 = vpop.f32.mrb[26].mxu0  ;;  %v1389_v14 = vsel %vm1370_vm2, %v1344_v35, 0.0 }
 0x2b6   :  { %v1075_v59 = vadd.f32 %v1997_v51, %v2757_v46  ;;  %v1069_v18 = vpop.f32.mrb[27].mxu0  ;;  %1390 = vadd.xlane.f32.xlu1 %v1389_v14  ;;  %1387 = vadd.xlane.f32.xlu0 %v1386_v15  ;;  %v1347_v1 = vmul.f32 %v1283_v40, %v1283_v40  ;;  %v1229_v51 = vpop.permute.xlu1 %1228 }
 0x2b7   :  { %v1346_v57 = vmul.f32 %v1282_v2, %v1282_v2  ;;  %v1070_v41 = vadd.f32 %v2757_v46, %v1069_v18  ;;  %v1227_v15 = vpop.permute.xlu0 %1226 }
 0x2b8   :  { %v1285_v63 = vsub.f32 %v1075_v59, %v2759_v16  ;;  %v1398_v61 = vsel %vm1370_vm2, %v1347_v1, 0.0 }
 0x2b9   :  { %v1284_v44 = vsub.f32 %v1070_v41, %v2762_v49  ;;  %v2000_v21 = vpop.f32.mrb[28].mxu0  ;;  %v1395_v48 = vsel %vm1370_vm2, %v1346_v57, 0.0 }
 0x2ba   :  { %v1085_v54 = vadd.f32 %v2000_v21, %v2757_v46  ;;  %v1079_v45 = vpop.f32.mrb[29].mxu0  ;;  %1396 = vadd.xlane.f32.xlu1 %v1395_v48  ;;  %1393 = vadd.xlane.f32.xlu0 %v1392_v42  ;;  %v1349_v58 = vmul.f32 %v1285_v63, %v1285_v63 }
 0x2bb   :  { %v1348_v62 = vmul.f32 %v1284_v44, %v1284_v44  ;;  %v1080_v53 = vadd.f32 %v2757_v46, %v1079_v45 }
 0x2bc   :  { %v1287_v60 = vsub.f32 %v1085_v54, %v2767_v17  ;;  %v1404_v9 = vsel %vm1370_vm2, %v1349_v58, 0.0 }
 0x2bd   :  { %v1286_v16 = vsub.f32 %v1080_v53, %v2770_v56  ;;  %v2003_v43 = vpop.f32.mrb[30].mxu0  ;;  %v1401_v49 = vsel %vm1370_vm2, %v1348_v62, 0.0  ;;  %v1233_v53 = vpop.permute.xlu1 %1232 }
 0x2be   :  { %v1095_v0 = vadd.f32 %v2003_v43, %v2757_v46  ;;  %v1089_v3 = vpop.f32.mrb[31].mxu0  ;;  %1402 = vadd.xlane.f32.xlu1 %v1401_v49  ;;  %1399 = vadd.xlane.f32.xlu0 %v1398_v61  ;;  %v1351_v5 = vmul.f32 %v1287_v60, %v1287_v60 }
 0x2bf   :  { %v1350_v47 = vmul.f32 %v1286_v16, %v1286_v16  ;;  %v1090_v52 = vadd.f32 %v2757_v46, %v1089_v3  ;;  %v1231_v16 = vpop.permute.xlu0 %1230 }
 0x2c0   :  { %v1289_v17 = vsub.f32 %v1095_v0, %v2776_v19  ;;  %v1410_v20 = vsel %vm1370_vm2, %v1351_v5, 0.0 }
 0x2c1   :  { %v1288_v56 = vsub.f32 %v1090_v52, %v2779_v23  ;;  %v2006_v7 = vpop.f32.mrb[32].mxu0  ;;  %v1407_v8 = vsel %vm1370_vm2, %v1350_v47, 0.0 }
 0x2c2   :  { %v1105_v10 = vadd.f32 %v2006_v7, %v2757_v46  ;;  %v1099_v11 = vpop.f32.mrb[33].mxu0  ;;  %1408 = vadd.xlane.f32.xlu1 %v1407_v8  ;;  %1405 = vadd.xlane.f32.xlu0 %v1404_v9  ;;  %v1353_v22 = vmul.f32 %v1289_v17, %v1289_v17  ;;  %v1237_v7 = vpop.permute.xlu1 %1236 }
 0x2c3   :  { %v1352_v12 = vmul.f32 %v1288_v56, %v1288_v56  ;;  %v1100_v13 = vadd.f32 %v2757_v46, %v1099_v11  ;;  %v1235_v9 = vpop.permute.xlu0 %1234 }
 0x2c4   :  { %v1291_v24 = vsub.f32 %v1105_v10, %v1213_v37  ;;  %v1416_v37 = vsel %vm1370_vm2, %v1353_v22, 0.0 }
 0x2c5   :  { %v1290_v19 = vsub.f32 %v1100_v13, %v1211_v39  ;;  %v2009_v25 = vpop.f32.mrb[34].mxu0  ;;  %v1413_v23 = vsel %vm1370_vm2, %v1352_v12, 0.0 }
 0x2c6   :  { %v1115_v27 = vadd.f32 %v2009_v25, %v2757_v46  ;;  %v1109_v28 = vpop.f32.mrb[35].mxu0  ;;  %1414 = vadd.xlane.f32.xlu1 %v1413_v23  ;;  %1411 = vadd.xlane.f32.xlu0 %v1410_v20  ;;  %v1355_v33 = vmul.f32 %v1291_v24, %v1291_v24 }
 0x2c7   :  { %v1354_v30 = vmul.f32 %v1290_v19, %v1290_v19  ;;  %v1110_v31 = vadd.f32 %v2757_v46, %v1109_v28 }
 0x2c8   :  { %v1293_v32 = vsub.f32 %v1115_v27, %v1217_v50  ;;  %v1422_v42 = vsel %vm1370_vm2, %v1355_v33, 0.0 }
 0x2c9   :  { %v1292_v34 = vsub.f32 %v1110_v31, %v1215_v55  ;;  %v2012_v35 = vpop.f32.mrb[36].mxu0  ;;  %v1419_v36 = vsel %vm1370_vm2, %v1354_v30, 0.0  ;;  %v1241_v31 = vpop.permute.xlu1 %1240 }
 0x2ca   :  { %v1125_v38 = vadd.f32 %v2012_v35, %v2757_v46  ;;  %v1119_v39 = vpop.f32.mrb[37].mxu0  ;;  %1420 = vadd.xlane.f32.xlu1 %v1419_v36  ;;  %1417 = vadd.xlane.f32.xlu0 %v1416_v37  ;;  %v1357_v14 = vmul.f32 %v1293_v32, %v1293_v32 }
 0x2cb   :  { %v1356_v40 = vmul.f32 %v1292_v34, %v1292_v34  ;;  %v1120_v2 = vadd.f32 %v2757_v46, %v1119_v39  ;;  %v1239_v34 = vpop.permute.xlu0 %1238 }
 0x2cc   :  { %v1295_v59 = vsub.f32 %v1125_v38, %v1221_v4  ;;  %v1428_v48 = vsel %vm1370_vm2, %v1357_v14, 0.0 }
 0x2cd   :  { %v1294_v18 = vsub.f32 %v1120_v2, %v1219_v6  ;;  %v2015_v57 = vpop.f32.mrb[38].mxu0  ;;  %v1425_v41 = vsel %vm1370_vm2, %v1356_v40, 0.0 }
 0x2ce   :  { %v1135_v1 = vadd.f32 %v2015_v57, %v2757_v46  ;;  %v1129_v63 = vpop.f32.mrb[39].mxu0  ;;  %1426 = vadd.xlane.f32.xlu1 %v1425_v41  ;;  %1423 = vadd.xlane.f32.xlu0 %v1422_v42  ;;  %v1359_v50 = vmul.f32 %v1295_v59, %v1295_v59  ;;  %v1306_v57 = vld [vmem:[#allocation2] sm:$0xff] }
 0x2cf   :  { %v1358_v44 = vmul.f32 %v1294_v18, %v1294_v18  ;;  %v1130_v21 = vadd.f32 %v2757_v46, %v1129_v63 }
 0x2d0   :  { %v1297_v54 = vsub.f32 %v1135_v1, %v1225_v26  ;;  %v1434_v4 = vsel %vm1370_vm2, %v1359_v50, 0.0  ;;  %v1310_v50 = vld [vmem:[#allocation2 + $0x20] sm:$0xff] }
 0x2d1   :  { %v1296_v45 = vsub.f32 %v1130_v21, %v1223_v29  ;;  %v2018_v55 = vpop.f32.mrb[40].mxu0  ;;  %v1431_v62 = vsel %vm1370_vm2, %v1358_v44, 0.0  ;;  %v1308_v44 = vld [vmem:[#allocation2 + $0x10] sm:$0xff] }
 0x2d2   :  { %v1145_v60 = vadd.f32 %v2018_v55, %v2757_v46  ;;  %v1139_v58 = vpop.f32.mrb[41].mxu0  ;;  %1432 = vadd.xlane.f32.xlu1 %v1431_v62  ;;  %1429 = vadd.xlane.f32.xlu0 %v1428_v48  ;;  %v1361_v0 = vmul.f32 %v1297_v54, %v1297_v54  ;;  %v1309_v54 = vld [vmem:[#allocation2 + $0x18] sm:$0xff] }
 0x2d3   :  { %v1360_v43 = vmul.f32 %v1296_v45, %v1296_v45  ;;  %v1140_v49 = vadd.f32 %v2757_v46, %v1139_v58 }
 0x2d4   :  { %v1299_v61 = vsub.f32 %v1145_v60, %v1229_v51  ;;  %v1440_v20 = vsel %vm1370_vm2, %v1361_v0, 0.0  ;;  %v1312_v60 = vld [vmem:[#allocation2 + $0x30] sm:$0xff] }
 0x2d5   :  { %v1298_v3 = vsub.f32 %v1140_v49, %v1227_v15  ;;  %v2021_v47 = vpop.f32.mrb[42].mxu0  ;;  %v1437_v52 = vsel %vm1370_vm2, %v1360_v43, 0.0  ;;  %v1311_v43 = vld [vmem:[#allocation2 + $0x28] sm:$0xff] }
 0x2d6   :  { %v1155_v5 = vadd.f32 %v2021_v47, %v2757_v46  ;;  %v1149_v6 = vpop.f32.mrb[43].mxu0  ;;  %1438 = vadd.xlane.f32.xlu1 %v1437_v52  ;;  %1435 = vadd.xlane.f32.xlu0 %v1434_v4  ;;  %v1363_v8 = vmul.f32 %v1299_v61, %v1299_v61 }
 0x2d7   :  { %v1362_v17 = vmul.f32 %v1298_v3, %v1298_v3  ;;  %v1150_v56 = vadd.f32 %v2757_v46, %v1149_v6  ;;  %v1313_v6 = vld [vmem:[#allocation2 + $0x38] sm:$0xff] }
 0x2d8   :  { %v1301_v10 = vsub.f32 %v1155_v5, %v1233_v53  ;;  %v1446_v23 = vsel %vm1370_vm2, %v1363_v8, 0.0  ;;  %v1314_v5 = vld [vmem:[#allocation2 + $0x40] sm:$0xff] }
 0x2d9   :  { %v1300_v11 = vsub.f32 %v1150_v56, %v1231_v16  ;;  %v2024_v12 = vpop.f32.mrb[44].mxu0  ;;  %v1443_v13 = vsel %vm1370_vm2, %v1362_v17, 0.0 }
 0x2da   :  { %v1165_v22 = vadd.f32 %v2024_v12, %v2757_v46  ;;  %v1159_v24 = vpop.f32.mrb[45].mxu0  ;;  %1444 = vadd.xlane.f32.xlu1 %v1443_v13  ;;  %1441 = vadd.xlane.f32.xlu0 %v1440_v20  ;;  %v1365_v26 = vmul.f32 %v1301_v10, %v1301_v10 }
 0x2db   :  { %v1364_v19 = vmul.f32 %v1300_v11, %v1300_v11  ;;  %v1160_v25 = vadd.f32 %v2757_v46, %v1159_v24  ;;  %v1316_v11 = vld [vmem:[#allocation2 + $0x50] sm:$0xff] }
 0x2dc   :  { %v1303_v27 = vsub.f32 %v1165_v22, %v1237_v7  ;;  %v1452_v2 = vsel %vm1370_vm2, %v1365_v26, 0.0  ;;  %v1315_v22 = vld [vmem:[#allocation2 + $0x48] sm:$0xff] }
 0x2dd   :  { %v1302_v28 = vsub.f32 %v1160_v25, %v1235_v9  ;;  %v2027_v29 = vpop.f32.mrb[46].mxu0  ;;  %v1449_v30 = vsel %vm1370_vm2, %v1364_v19, 0.0 }
 0x2de   :  { %v1175_v32 = vadd.f32 %v2027_v29, %v2757_v46  ;;  %v1169_v33 = vpop.f32.mrb[47].mxu0  ;;  %1450 = vadd.xlane.f32.xlu1 %v1449_v30  ;;  %1447 = vadd.xlane.f32.xlu0 %v1446_v23  ;;  %v1367_v38 = vmul.f32 %v1303_v27, %v1303_v27  ;;  %v1318_v29 = vld [vmem:[#allocation2 + $0x60] sm:$0xff] }
 0x2df   :  { %v1366_v35 = vmul.f32 %v1302_v28, %v1302_v28  ;;  %v1170_v36 = vadd.f32 %v2757_v46, %v1169_v33  ;;  %v1307_v46 = vld [vmem:[#allocation2 + $0x8] sm:$0xff]  ;;  %v1317_v33 = vld [vmem:[#allocation2 + $0x58] sm:$0xff] }
 0x2e0   :  { %v1305_v37 = vsub.f32 %v1175_v32, %v1241_v31  ;;  %v1458_v18 = vsel %vm1370_vm2, %v1367_v38, 0.0 }
 0x2e1   :  { %v1304_v39 = vsub.f32 %v1170_v36, %v1239_v34  ;;  %v1455_v40 = vsel %vm1370_vm2, %v1366_v35, 0.0 }
 0x2e2   :  { %v1369_v51 = vmul.f32 %v1305_v37, %v1305_v37  ;;  %1456 = vadd.xlane.f32.xlu1 %v1455_v40  ;;  %1453 = vadd.xlane.f32.xlu0 %v1452_v2  ;;  %v1320_v2 = vld [vmem:[#allocation2 + $0x70] sm:$0xff] }
 0x2e3   :  { %v1368_v14 = vmul.f32 %v1304_v39, %v1304_v39 }
 0x2e4   :  { %v1464_v15 = vsel %vm1370_vm2, %v1369_v51, 0.0 }
 0x2e5   :  { %v1461_v59 = vsel %vm1370_vm2, %v1368_v14, 0.0 }
 0x2e6   :  { %1462 = vadd.xlane.f32.xlu1 %v1461_v59  ;;  %1459 = vadd.xlane.f32.xlu0 %v1458_v18  ;;  %v1319_v59 = vld [vmem:[#allocation2 + $0x68] sm:$0xff] }
 0x2ea   :  { %1465 = vadd.xlane.f32.xlu0 %v1464_v15 }
 0x336   :  { %v1376_v41 = vpop.xlane.xlu1 %1375 }
 0x337   :  { %v1468_v42 = vadd.f32 %v1376_v41, %v1307_v46  ;;  %v1373_v1 = vpop.xlane.xlu0 %1372 }
 0x338   :  { %v1467_v63 = vadd.f32 %v1373_v1, %v1306_v57 }
 0x339   :  { %1501 = vst.msk [vmem:[#allocation2 + $0x8] sm:$0xff] %vm53_vm3, %v1468_v42 }
 0x33a   :  { %1500 = vst.msk [vmem:[#allocation2] sm:$0xff] %vm53_vm3, %v1467_v63 }
 0x33b   :  { %v1379_v21 = vpop.xlane.xlu0 %1378 }
 0x33c   :  { %v1469_v48 = vadd.f32 %v1379_v21, %v1308_v44  ;;  %v1322_v44 = vld [vmem:[#allocation2 + $0x80] sm:$0xff] }
 0x33e   :  { %1502 = vst.msk [vmem:[#allocation2 + $0x10] sm:$0xff] %vm53_vm3, %v1469_v48 }
 0x33f   :  { %v1385_v45 = vpop.xlane.xlu1 %1384  ;;  %v1382_v55 = vpop.xlane.xlu0 %1381 }
 0x340   :  { %v1471_v62 = vadd.f32 %v1385_v45, %v1310_v50  ;;  %v1470_v53 = vadd.f32 %v1382_v55, %v1309_v54  ;;  %v1536_v58 = vld [vmem:[#allocation2 + $0x8] sm:$0xff]  ;;  %v1321_v54 = vld [vmem:[#allocation2 + $0x78] sm:$0xff] }
 0x341   :  { %v1535_v16 = vld [vmem:[#allocation2] sm:$0xff]  ;;  %v1568_v0 = vsel %vm53_vm3, %v1536_v58, 0.0 }
 0x342   :  { %1504 = vst.msk [vmem:[#allocation2 + $0x20] sm:$0xff] %vm53_vm3, %v1471_v62  ;;  %1503 = vst.msk [vmem:[#allocation2 + $0x18] sm:$0xff] %vm53_vm3, %v1470_v53  ;;  %v1567_v3 = vsel %vm53_vm3, %v1535_v16, 0.0 }
 0x343   :  { %v1391_v49 = vpop.xlane.xlu1 %1390  ;;  %v1388_v61 = vpop.xlane.xlu0 %1387  ;;  %v1569_v56 = vadd.f32 %v1568_v0, %v1567_v3  ;;  %v1323_v3 = vld [vmem:[#allocation2 + $0x88] sm:$0xff] }
 0x344   :  { %v1473_v47 = vadd.f32 %v1391_v49, %v1312_v60  ;;  %v1472_v52 = vadd.f32 %v1388_v61, %v1311_v43  ;;  %v1324_v43 = vld [vmem:[#allocation2 + $0x90] sm:$0xff] }
 0x345   :  { %v1537_v4 = vld [vmem:[#allocation2 + $0x10] sm:$0xff] }
 0x346   :  { %v1570_v17 = vsel %vm53_vm3, %v1537_v4, 0.0  ;;  %1506 = vst.msk [vmem:[#allocation2 + $0x30] sm:$0xff] %vm53_vm3, %v1473_v47  ;;  %1505 = vst.msk [vmem:[#allocation2 + $0x28] sm:$0xff] %vm53_vm3, %v1472_v52 }
 0x347   :  { %v1397_v7 = vpop.xlane.xlu1 %1396  ;;  %v1394_v8 = vpop.xlane.xlu0 %1393  ;;  %v1571_v12 = vadd.f32 %v1570_v17, %v1569_v56 }
 0x348   :  { %v1475_v9 = vadd.f32 %v1397_v7, %v1314_v5  ;;  %v1474_v10 = vadd.f32 %v1394_v8, %v1313_v6  ;;  %v1326_v7 = vld [vmem:[#allocation2 + $0xa0] sm:$0xff] }
 0x349   :  { %v1539_v13 = vld [vmem:[#allocation2 + $0x20] sm:$0xff]  ;;  %v1538_v20 = vld [vmem:[#allocation2 + $0x18] sm:$0xff] }
 0x34a   :  { %v1572_v24 = vsel %vm53_vm3, %v1538_v20, 0.0  ;;  %1508 = vst.msk [vmem:[#allocation2 + $0x40] sm:$0xff] %vm53_vm3, %v1475_v9  ;;  %1507 = vst.msk [vmem:[#allocation2 + $0x38] sm:$0xff] %vm53_vm3, %v1474_v10  ;;  %v1574_v26 = vsel %vm53_vm3, %v1539_v13, 0.0 }
 0x34b   :  { %v1573_v19 = vadd.f32 %v1572_v24, %v1571_v12  ;;  %v1403_v25 = vpop.xlane.xlu1 %1402  ;;  %v1400_v23 = vpop.xlane.xlu0 %1399 }
 0x34c   :  { %v1477_v27 = vadd.f32 %v1403_v25, %v1316_v11  ;;  %v1476_v28 = vadd.f32 %v1400_v23, %v1315_v22  ;;  %v1325_v11 = vld [vmem:[#allocation2 + $0x98] sm:$0xff]  ;;  %v1328_v23 = vld [vmem:[#allocation2 + $0xb0] sm:$0xff] }
 0x34d   :  { %v1541_v30 = vld [vmem:[#allocation2 + $0x30] sm:$0xff]  ;;  %v1540_v31 = vld [vmem:[#allocation2 + $0x28] sm:$0xff]  ;;  %v1575_v32 = vadd.f32 %v1574_v26, %v1573_v19 }
 0x34e   :  { %v1576_v34 = vsel %vm53_vm3, %v1540_v31, 0.0  ;;  %1510 = vst.msk [vmem:[#allocation2 + $0x50] sm:$0xff] %vm53_vm3, %v1477_v27  ;;  %1509 = vst.msk [vmem:[#allocation2 + $0x48] sm:$0xff] %vm53_vm3, %v1476_v28  ;;  %v1578_v38 = vsel %vm53_vm3, %v1541_v30, 0.0 }
 0x34f   :  { %v1577_v35 = vadd.f32 %v1576_v34, %v1575_v32  ;;  %v1409_v36 = vpop.xlane.xlu1 %1408  ;;  %v1406_v37 = vpop.xlane.xlu0 %1405 }
 0x350   :  { %v1479_v39 = vadd.f32 %v1409_v36, %v1318_v29  ;;  %v1478_v40 = vadd.f32 %v1406_v37, %v1317_v33  ;;  %v1327_v29 = vld [vmem:[#allocation2 + $0xa8] sm:$0xff]  ;;  %v1330_v37 = vld [vmem:[#allocation2 + $0xc0] sm:$0xff] }
 0x351   :  { %v1543_v51 = vld [vmem:[#allocation2 + $0x40] sm:$0xff]  ;;  %v1542_v14 = vld [vmem:[#allocation2 + $0x38] sm:$0xff]  ;;  %v1579_v15 = vadd.f32 %v1578_v38, %v1577_v35 }
 0x352   :  { %v1580_v18 = vsel %vm53_vm3, %v1542_v14, 0.0  ;;  %1512 = vst.msk [vmem:[#allocation2 + $0x60] sm:$0xff] %vm53_vm3, %v1479_v39  ;;  %1511 = vst.msk [vmem:[#allocation2 + $0x58] sm:$0xff] %vm53_vm3, %v1478_v40  ;;  %v1582_v42 = vsel %vm53_vm3, %v1543_v51, 0.0  ;;  %v1329_v40 = vld [vmem:[#allocation2 + $0xb8] sm:$0xff] }
 0x353   :  { %v1581_v46 = vadd.f32 %v1580_v18, %v1579_v15  ;;  %v1415_v57 = vpop.xlane.xlu1 %1414  ;;  %v1412_v41 = vpop.xlane.xlu0 %1411 }
 0x354   :  { %v1481_v1 = vadd.f32 %v1415_v57, %v1320_v2  ;;  %v1480_v63 = vadd.f32 %v1412_v41, %v1319_v59  ;;  %v1332_v57 = vld [vmem:[#allocation2 + $0xd0] sm:$0xff] }
 0x355   :  { %v1545_v21 = vld [vmem:[#allocation2 + $0x50] sm:$0xff]  ;;  %v1544_v48 = vld [vmem:[#allocation2 + $0x48] sm:$0xff]  ;;  %v1583_v50 = vadd.f32 %v1582_v42, %v1581_v46 }
 0x356   :  { %v1584_v45 = vsel %vm53_vm3, %v1544_v48, 0.0  ;;  %1514 = vst.msk [vmem:[#allocation2 + $0x70] sm:$0xff] %vm53_vm3, %v1481_v1  ;;  %1513 = vst.msk [vmem:[#allocation2 + $0x68] sm:$0xff] %vm53_vm3, %v1480_v63  ;;  %v1586_v60 = vsel %vm53_vm3, %v1545_v21, 0.0  ;;  %v1331_v42 = vld [vmem:[#allocation2 + $0xc8] sm:$0xff] }
 0x357   :  { %v1585_v55 = vadd.f32 %v1584_v45, %v1583_v50  ;;  %v1421_v62 = vpop.xlane.xlu1 %1420  ;;  %v1418_v53 = vpop.xlane.xlu0 %1417 }
 0x358   :  { %v1483_v58 = vadd.f32 %v1421_v62, %v1322_v44  ;;  %v1482_v16 = vadd.f32 %v1418_v53, %v1321_v54  ;;  %v1334_v62 = vld [vmem:[#allocation2 + $0xe0] sm:$0xff] }
 0x359   :  { %v1547_v49 = vld [vmem:[#allocation2 + $0x60] sm:$0xff]  ;;  %v1546_v61 = vld [vmem:[#allocation2 + $0x58] sm:$0xff]  ;;  %v1587_v0 = vadd.f32 %v1586_v60, %v1585_v55 }
 0x35a   :  { %v1588_v47 = vsel %vm53_vm3, %v1546_v61, 0.0  ;;  %1516 = vst.msk [vmem:[#allocation2 + $0x80] sm:$0xff] %vm53_vm3, %v1483_v58  ;;  %1515 = vst.msk [vmem:[#allocation2 + $0x78] sm:$0xff] %vm53_vm3, %v1482_v16  ;;  %v1590_v6 = vsel %vm53_vm3, %v1547_v49, 0.0  ;;  %v1333_v60 = vld [vmem:[#allocation2 + $0xd8] sm:$0xff] }
 0x35b   :  { %v1589_v52 = vadd.f32 %v1588_v47, %v1587_v0  ;;  %v1427_v4 = vpop.xlane.xlu1 %1426  ;;  %v1424_v5 = vpop.xlane.xlu0 %1423 }
 0x35c   :  { %v1485_v17 = vadd.f32 %v1427_v4, %v1324_v43  ;;  %v1484_v56 = vadd.f32 %v1424_v5, %v1323_v3  ;;  %v1336_v4 = vld [vmem:[#allocation2 + $0xf0] sm:$0xff] }
 0x35d   :  { %v1549_v8 = vld [vmem:[#allocation2 + $0x70] sm:$0xff]  ;;  %v1548_v9 = vld [vmem:[#allocation2 + $0x68] sm:$0xff]  ;;  %v1591_v10 = vadd.f32 %v1590_v6, %v1589_v52 }
 0x35e   :  { %v1592_v12 = vsel %vm53_vm3, %v1548_v9, 0.0  ;;  %1518 = vst.msk [vmem:[#allocation2 + $0x90] sm:$0xff] %vm53_vm3, %v1485_v17  ;;  %1517 = vst.msk [vmem:[#allocation2 + $0x88] sm:$0xff] %vm53_vm3, %v1484_v56  ;;  %v1594_v24 = vsel %vm53_vm3, %v1549_v8, 0.0  ;;  %v1335_v6 = vld [vmem:[#allocation2 + $0xe8] sm:$0xff] }
 0x35f   :  { %v1593_v13 = vadd.f32 %v1592_v12, %v1591_v10  ;;  %v1433_v20 = vpop.xlane.xlu1 %1432  ;;  %v1430_v22 = vpop.xlane.xlu0 %1429 }
 0x360   :  { %v1487_v19 = vadd.f32 %v1433_v20, %v1326_v7  ;;  %v1486_v25 = vadd.f32 %v1430_v22, %v1325_v11  ;;  %v1337_v22 = vld [vmem:[#allocation2 + $0xf8] sm:$0xff] }
 0x361   :  { %v1551_v26 = vld [vmem:[#allocation2 + $0x80] sm:$0xff]  ;;  %v1550_v27 = vld [vmem:[#allocation2 + $0x78] sm:$0xff]  ;;  %v1595_v28 = vadd.f32 %v1594_v24, %v1593_v13 }
 0x362   :  { %v1596_v30 = vsel %vm53_vm3, %v1550_v27, 0.0  ;;  %1520 = vst.msk [vmem:[#allocation2 + $0xa0] sm:$0xff] %vm53_vm3, %v1487_v19  ;;  %1519 = vst.msk [vmem:[#allocation2 + $0x98] sm:$0xff] %vm53_vm3, %v1486_v25  ;;  %v1598_v34 = vsel %vm53_vm3, %v1551_v26, 0.0 }
 0x363   :  { %v1597_v31 = vadd.f32 %v1596_v30, %v1595_v28  ;;  %v1439_v32 = vpop.xlane.xlu1 %1438  ;;  %v1436_v33 = vpop.xlane.xlu0 %1435 }
 0x364   :  { %v1489_v35 = vadd.f32 %v1439_v32, %v1328_v23  ;;  %v1488_v36 = vadd.f32 %v1436_v33, %v1327_v29 }
 0x365   :  { %v1553_v38 = vld [vmem:[#allocation2 + $0x90] sm:$0xff]  ;;  %v1552_v39 = vld [vmem:[#allocation2 + $0x88] sm:$0xff]  ;;  %v1599_v2 = vadd.f32 %v1598_v34, %v1597_v31 }
 0x366   :  { %v1600_v51 = vsel %vm53_vm3, %v1552_v39, 0.0  ;;  %1522 = vst.msk [vmem:[#allocation2 + $0xb0] sm:$0xff] %vm53_vm3, %v1489_v35  ;;  %1521 = vst.msk [vmem:[#allocation2 + $0xa8] sm:$0xff] %vm53_vm3, %v1488_v36  ;;  %v1602_v41 = vsel %vm53_vm3, %v1553_v38, 0.0 }
 0x367   :  { %v1445_v14 = vpop.xlane.xlu1 %1444  ;;  %v1442_v15 = vpop.xlane.xlu0 %1441  ;;  %v1601_v59 = vadd.f32 %v1600_v51, %v1599_v2 }
 0x368   :  { %v1491_v18 = vadd.f32 %v1445_v14, %v1330_v37  ;;  %v1490_v46 = vadd.f32 %v1442_v15, %v1329_v40 }
 0x369   :  { %v1554_v1 = vld [vmem:[#allocation2 + $0x98] sm:$0xff]  ;;  %v1555_v63 = vld [vmem:[#allocation2 + $0xa0] sm:$0xff]  ;;  %v1603_v44 = vadd.f32 %v1602_v41, %v1601_v59 }
 0x36a   :  { %1524 = vst.msk [vmem:[#allocation2 + $0xc0] sm:$0xff] %vm53_vm3, %v1491_v18  ;;  %1523 = vst.msk [vmem:[#allocation2 + $0xb8] sm:$0xff] %vm53_vm3, %v1490_v46  ;;  %v1604_v21 = vsel %vm53_vm3, %v1554_v1, 0.0  ;;  %v1606_v53 = vsel %vm53_vm3, %v1555_v63, 0.0 }
 0x36b   :  { %v1451_v48 = vpop.xlane.xlu1 %1450  ;;  %v1448_v50 = vpop.xlane.xlu0 %1447  ;;  %v1605_v54 = vadd.f32 %v1604_v21, %v1603_v44 }
 0x36c   :  { %v1493_v45 = vadd.f32 %v1451_v48, %v1332_v57  ;;  %v1492_v55 = vadd.f32 %v1448_v50, %v1331_v42 }
 0x36d   :  { %v1556_v58 = vld [vmem:[#allocation2 + $0xa8] sm:$0xff]  ;;  %v1557_v16 = vld [vmem:[#allocation2 + $0xb0] sm:$0xff]  ;;  %v1607_v43 = vadd.f32 %v1606_v53, %v1605_v54 }
 0x36e   :  { %1526 = vst.msk [vmem:[#allocation2 + $0xd0] sm:$0xff] %vm53_vm3, %v1493_v45  ;;  %1525 = vst.msk [vmem:[#allocation2 + $0xc8] sm:$0xff] %vm53_vm3, %v1492_v55  ;;  %v1608_v49 = vsel %vm53_vm3, %v1556_v58, 0.0  ;;  %v1610_v5 = vsel %vm53_vm3, %v1557_v16, 0.0 }
 0x36f   :  { %v1457_v61 = vpop.xlane.xlu1 %1456  ;;  %v1454_v0 = vpop.xlane.xlu0 %1453  ;;  %v1609_v3 = vadd.f32 %v1608_v49, %v1607_v43 }
 0x370   :  { %v1495_v47 = vadd.f32 %v1457_v61, %v1334_v62  ;;  %v1494_v52 = vadd.f32 %v1454_v0, %v1333_v60 }
 0x371   :  { %v1558_v17 = vld [vmem:[#allocation2 + $0xb8] sm:$0xff]  ;;  %v1559_v56 = vld [vmem:[#allocation2 + $0xc0] sm:$0xff]  ;;  %v1611_v7 = vadd.f32 %v1610_v5, %v1609_v3 }
 0x372   :  { %1528 = vst.msk [vmem:[#allocation2 + $0xe0] sm:$0xff] %vm53_vm3, %v1495_v47  ;;  %1527 = vst.msk [vmem:[#allocation2 + $0xd8] sm:$0xff] %vm53_vm3, %v1494_v52  ;;  %v1612_v8 = vsel %vm53_vm3, %v1558_v17, 0.0  ;;  %v1614_v20 = vsel %vm53_vm3, %v1559_v56, 0.0 }
 0x373   :  { %v1463_v9 = vpop.xlane.xlu1 %1462  ;;  %v1460_v10 = vpop.xlane.xlu0 %1459  ;;  %v1613_v11 = vadd.f32 %v1612_v8, %v1611_v7 }
 0x374   :  { %v1497_v12 = vadd.f32 %v1463_v9, %v1336_v4  ;;  %v1496_v13 = vadd.f32 %v1460_v10, %v1335_v6 }
 0x375   :  { %v1560_v24 = vld [vmem:[#allocation2 + $0xc8] sm:$0xff]  ;;  %v1561_v19 = vld [vmem:[#allocation2 + $0xd0] sm:$0xff]  ;;  %v1615_v25 = vadd.f32 %v1614_v20, %v1613_v11 }
 0x376   :  { %1530 = vst.msk [vmem:[#allocation2 + $0xf0] sm:$0xff] %vm53_vm3, %v1497_v12  ;;  %1529 = vst.msk [vmem:[#allocation2 + $0xe8] sm:$0xff] %vm53_vm3, %v1496_v13  ;;  %v1616_v23 = vsel %vm53_vm3, %v1560_v24, 0.0  ;;  %v1618_v29 = vsel %vm53_vm3, %v1561_v19, 0.0 }
 0x377   :  { %v1466_v26 = vpop.xlane.xlu0 %1465  ;;  %v1617_v27 = vadd.f32 %v1616_v23, %v1615_v25 }
 0x378   :  { %v1498_v28 = vadd.f32 %v1466_v26, %v1337_v22 }
 0x379   :  { %v1562_v30 = vld [vmem:[#allocation2 + $0xd8] sm:$0xff]  ;;  %v1563_v31 = vld [vmem:[#allocation2 + $0xe0] sm:$0xff]  ;;  %v1619_v32 = vadd.f32 %v1618_v29, %v1617_v27 }
 0x37a   :  { %1531 = vst.msk [vmem:[#allocation2 + $0xf8] sm:$0xff] %vm53_vm3, %v1498_v28  ;;  %v1620_v33 = vsel %vm53_vm3, %v1562_v30, 0.0  ;;  %v1622_v35 = vsel %vm53_vm3, %v1563_v31, 0.0 }
 0x37b   :  { %v1621_v34 = vadd.f32 %v1620_v33, %v1619_v32 }
 0x37d   :  { %v1564_v36 = vld [vmem:[#allocation2 + $0xe8] sm:$0xff]  ;;  %v1565_v37 = vld [vmem:[#allocation2 + $0xf0] sm:$0xff]  ;;  %v1623_v38 = vadd.f32 %v1622_v35, %v1621_v34 }
 0x37e   :  { %v1624_v39 = vsel %vm53_vm3, %v1564_v36, 0.0  ;;  %v1626_v2 = vsel %vm53_vm3, %v1565_v37, 0.0 }
 0x37f   :  { %v1625_v40 = vadd.f32 %v1624_v39, %v1623_v38 }
 0x381   :  { %v1566_v51 = vld [vmem:[#allocation2 + $0xf8] sm:$0xff]  ;;  %v1627_v14 = vadd.f32 %v1626_v2, %v1625_v40 }
 0x382   :  { %v1628_v15 = vsel %vm53_vm3, %v1566_v51, 0.0 }
 0x383   :  { %v1629_v59 = vadd.f32 %v1628_v15, %v1627_v14 }
 0x385   :  { %v1630_v18 = vrot.slane %v1629_v59, 4 }
 0x387   :  { %v1631_v46 = vadd.f32 %v1630_v18, %v1629_v59 }
 0x389   :  { %v1632_v57 = vrot.slane %v1631_v46, 2 }
 0x38b   :  { %v1633_v41 = vadd.f32 %v1632_v57, %v1631_v46 }
 0x38d   :  { %v1634_v42 = vrot.slane %v1633_v41, 1 }
 0x38f   :  { %v1635_v1 = vadd.f32 %v1634_v42, %v1633_v41 }
 0x391   :  { %v1636_v63 = vmul.f32 0.0009765625, %v1635_v1 }
 0x393   :  { %1638 = vst.msk [vmem:[#allocation3] sm:$0x1] %vm1637_vm4, %v1636_v63 }
 0x394   :  { %2192 = shalt.err (!%p2189_p4)
}
 0x395   :  { %s2193_s17 = scalar_lea.hbm %s2960_s7, 16 }
 0x396   :  { %p2194_p5 = scmp.ne.s32.totalorder %s2960_s7, %s2193_s17  ;;  %p2197_p6 = scmp.lt.u32.totalorder %s2193_s17, %s2960_s7 }
 0x398   :  { %p2199_p7 = pnand %p2197_p6, %p2194_p5 }
 0x39a   :  { %2202 = shalt.err (!%p2199_p7)
}
 0x39b   :  { %1648 = dma.vmem_to_hbm [thread:$0]  %s1646_s13, 16, %s2960_s7, [#allocation4]  }
 0x39c   :  { %2203 = dma.done.wait [#allocation4], 16  }
 0x39d   :  { %2204 = vsyncadd [#allocation4], 4294967280 }
 0x39e   :  { %1652 = vsyncpa [#allocation4], 1 }

</bundles_post_ra>
